<compile_context>
chip_gen: v5e
topology: v5e:2x2
jax: 0.10.0
libtpu: 0.0.40
codegen_flags: <defaults>
</compile_context>

<pallas_src>
import functools
import numpy as np
import jax
import jax.numpy as jnp
from jax import lax
from jax.experimental import pallas as pl
from jax.experimental.pallas import tpu as pltpu

KSIZE = 9
PAD = 4
LN_EPS = 1e-6
INV_SQRT2 = 0.7071067811865476


def _round_up(x, m):
    return ((x + m - 1) // m) * m


# ----------------------------- in-kernel helpers -----------------------------

def _shift_rows(x, o, use_roll):
    """result[r] = x[r + o]; rows shifted in from outside are garbage/zero and are
    zeroed by the caller's per-tap edge mask."""
    if o == 0:
        return x
    M, D = x.shape
    if use_roll:
        # XLU sublane rotation; wrap-around rows are masked out by the caller.
        return pltpu.roll(x, (-o) % M, 0)
    # Fallback for sublane-unaligned row counts: static slice + zero pad.
    if o > 0:
        return jnp.concatenate([x[o:, :], jnp.zeros((o, D), x.dtype)], axis=0)
    return jnp.concatenate([jnp.zeros((-o, D), x.dtype), x[:o, :]], axis=0)


def _dwconv(x, w_ref, b_ref, pos, L, use_roll):
    """Depthwise conv1d (kernel 9, zero pad 4) along the batch-folded row axis.
    x: (M, D); w_ref: (9, D) taps; b_ref: (1, D); pos: (M, 1) float32 position of
    each row inside its own sample (rows of different samples never mix)."""
    M, D = x.shape
    acc = jnp.zeros((M, D), jnp.float32) + b_ref[...]
    for k in range(KSIZE):                           # static, unrolled taps
        o = k - PAD
        term = _shift_rows(x, o, use_roll) * w_ref[k:k + 1, :]
        # Branch-free float edge mask: zero taps that would read before/after the
        # sample (implements the conv's zero padding and blocks cross-sample mixing).
        if o < 0:
            term = term * jnp.clip(pos + float(o + 1), 0.0, 1.0)
        elif o > 0:
            term = term * jnp.clip(float(L - o) - pos, 0.0, 1.0)
        acc = acc + term
    return acc


def _layernorm(y, w_ref, b_ref):
    """Channels-last LayerNorm over D (matches F.layer_norm, eps=1e-6)."""
    mu = jnp.mean(y, axis=-1, keepdims=True)
    var = jnp.mean((y - mu) ** 2, axis=-1, keepdims=True)
    return (y - mu) * lax.rsqrt(var + LN_EPS) * w_ref[...] + b_ref[...]


def _gelu(x):
    """Exact (erf) GELU, same as torch.nn.GELU()."""
    return 0.5 * x * (1.0 + lax.erf(x * INV_SQRT2))


def _mlp(x, w1_ref, b1_ref, w2_ref, b2_ref):
    """Linear(d,4d) -> GELU -> Linear(4d,d). MXU operands in bf16, f32 accumulate."""
    h = jnp.dot(x.astype(jnp.bfloat16), w1_ref[...].astype(jnp.bfloat16),
                preferred_element_type=jnp.float32) + b1_ref[...]
    h = _gelu(h)
    return jnp.dot(h.astype(jnp.bfloat16), w2_ref[...].astype(jnp.bfloat16),
                   preferred_element_type=jnp.float32) + b2_ref[...]


# ------------------------------- fused kernel --------------------------------

def _fused_kernel(*refs, L, has_qp, use_roll):
    if has_qp:
        tgt_ref, qp_ref, mem_ref, mask_ref, pos_ref, *rest = refs
    else:
        tgt_ref, mem_ref, mask_ref, pos_ref, *rest = refs
        qp_ref = None
    (wc1_ref, bc1_ref, ln1w_ref, ln1b_ref,
     w11_ref, b11_ref, w12_ref, b12_ref, g1_ref,
     wc2_ref, bc2_ref, ln2w_ref, ln2b_ref,
     w21_ref, b21_ref, w22_ref, b22_ref, g2_ref,
     pool_ref, out_ref) = rest

    m = mask_ref[...]                # (M, 1) float MaskedConv1D output mask
    pos = pos_ref[...]               # (M, 1) float within-sample position

    # Local-memory (Mamba, frozen => identity) branch folds to tgt += tgt.
    t = 2.0 * tgt_ref[...]                                   # (M, D)
    x1 = t + qp_ref[...] if has_qp else t

    # ---- ConvNeXt block 1: masked dwconv -> LN -> MLP -> gamma1 -> residual ----
    y1 = _dwconv(x1, wc1_ref, bc1_ref, pos, L, use_roll) * m
    n1 = _layernorm(y1, ln1w_ref, ln1b_ref)
    t = t + _mlp(n1, w11_ref, b11_ref, w12_ref, b12_ref) * g1_ref[...]
    # F.interpolate(tgt, size=N) is the identity here (L == N, enforced in wrapper).

    # ---- ConvNeXt block 2: (+memory) masked dwconv + residual -> LN -> MLP ----
    x2 = t + mem_ref[...]
    c2 = _dwconv(x2, wc2_ref, bc2_ref, pos, L, use_roll) * m + t
    n2 = _layernorm(c2, ln2w_ref, ln2b_ref)
    out = n2 + _mlp(n2, w21_ref, b21_ref, w22_ref, b22_ref) * g2_ref[...]

    # ---- AdaptiveAvgPool1d over the sequence, fused as a (block-diagonal,
    # sublane-padded) pooling matmul: (BB*QP, M) @ (M, D) in f32 ----
    out_ref[...] = jnp.dot(pool_ref[...], out, preferred_element_type=jnp.float32)


# --------------------------------- wrapper ------------------------------------

def _pool_matrix(N, qN, QP, BB):
    """torch.nn.AdaptiveAvgPool1d(qN) as a matmul, zero-padded to QP rows and laid
    out block-diagonally over the BB samples folded into one grid block."""
    base = np.zeros((QP, N), np.float32)
    for j in range(qN):
        start = (j * N) // qN
        end = -((-(j + 1) * N) // qN)        # ceil((j+1)*N/qN)
        base[j, start:end] = 1.0 / (end - start)
    mat = np.zeros((BB * QP, BB * N), np.float32)
    for b in range(BB):
        mat[b * QP:(b + 1) * QP, b * N:(b + 1) * N] = base
    return jnp.asarray(mat)


def _run_fused(x_flat, qp_flat, mem_flat, mask_flat, pos_flat, poolT, p,
               *, L, BB, G, QP, d):
    H = 4 * d
    M = BB * L
    row = lambda g: (g, 0)
    full = lambda g: (0, 0)

    in_specs = [pl.BlockSpec((M, d), row)]
    inputs = [x_flat]
    if qp_flat is not None:
        in_specs.append(pl.BlockSpec((M, d), row))
        inputs.append(qp_flat)
    in_specs += [pl.BlockSpec((M, d), row),      # memory
                 pl.BlockSpec((M, 1), row),      # mask
                 pl.BlockSpec((M, 1), row)]      # within-sample position
    inputs += [mem_flat, mask_flat, pos_flat]

    pspec = lambda shape: pl.BlockSpec(shape, full)
    in_specs += [pspec((KSIZE, d)), pspec((1, d)), pspec((1, d)), pspec((1, d)),
                 pspec((d, H)), pspec((1, H)), pspec((H, d)), pspec((1, d)),
                 pspec((1, d)),
                 pspec((KSIZE, d)), pspec((1, d)), pspec((1, d)), pspec((1, d)),
                 pspec((d, H)), pspec((1, H)), pspec((H, d)), pspec((1, d)),
                 pspec((1, d)),
                 pspec((BB * QP, M))]
    inputs += [p["wconv1"], p["bconv1"], p["lnw1"], p["lnb1"],
               p["w1_1"], p["b1_1"], p["w1_2"], p["b1_2"], p["gamma1"],
               p["wconv2"], p["bconv2"], p["lnw2"], p["lnb2"],
               p["w2_1"], p["b2_1"], p["w2_2"], p["b2_2"], p["gamma2"],
               poolT]

    use_roll = (M % 8 == 0)      # roll path needs sublane-aligned row count
    kernel = functools.partial(_fused_kernel, L=L,
                               has_qp=qp_flat is not None, use_roll=use_roll)
    return pl.pallas_call(
        kernel,
        out_shape=jax.ShapeDtypeStruct((G * BB * QP, d), jnp.float32),
        grid_spec=pltpu.PrefetchScalarGridSpec(
            num_scalar_prefetch=0,
            grid=(G,),
            in_specs=in_specs,
            out_specs=pl.BlockSpec((BB * QP, d), row),
        ),
        compiler_params=pltpu.CompilerParams(
            dimension_semantics=("parallel",)),
    )(*inputs)


def deco_decoder_layer_forward(tgt, memory, mask, params, query_pos=None,
                               qN=10, T=4):
    """tgt: (B, d, L), memory: (B, d, N), mask: (B, 1, L) bool (PyTorch NCL).
    Returns ((B, d, qN), mask) like DecoDecoderLayer.forward."""
    B, d, L = tgt.shape
    _, _, N = memory.shape
    assert d % T == 0
    # The PyTorch module broadcasts the length-L mask onto the length-N dwconv2
    # input and F.interpolate(..., size=N) is then the identity, so L == N is
    # required (same implicit constraint as the reference module).
    assert L == N, "DecoDecoderLayer requires L == N (mask reuse in dwconv2)"

    QP = _round_up(qN, 8)        # pad pool rows to a sublane multiple
    # Batch blocking: at most 2 "parallel" grid steps (keeps both v7x TensorCores
    # busy); the remaining batch is folded into the matmul M dimension.
    if B >= 2 and B % 2 == 0 and ((B // 2) * L) % 8 == 0:
        G = 2
    else:
        G = 1
    BB = B // G

    # Channels-last, batch-flattened (B*L, d) views. All remaining glue (2x
    # local-memory scale, query_pos add, residuals, interp, pooling) is inside
    # the single fused kernel.
    x_flat = tgt.transpose(0, 2, 1).reshape(B * L, d)
    mem_flat = memory.transpose(0, 2, 1).reshape(B * N, d)
    mask_flat = mask.astype(jnp.float32).transpose(0, 2, 1).reshape(B * L, 1)
    pos_flat = jnp.tile(jnp.arange(L, dtype=jnp.float32), B)[:, None]
    qp_flat = (None if query_pos is None
               else query_pos.transpose(0, 2, 1).reshape(B * L, d))

    poolT = _pool_matrix(N, qN, QP, BB)          # trace-time constant

    out_flat = _run_fused(x_flat, qp_flat, mem_flat, mask_flat, pos_flat,
                          poolT, params, L=L, BB=BB, G=G, QP=QP, d=d)
    out = out_flat.reshape(B, QP, d)[:, :qN, :].transpose(0, 2, 1)   # (B, d, qN)
    return out, mask


# ----------------------------- parameter setup --------------------------------

def init_params(key, d):
    H = 4 * d
    ks = jax.random.split(key, 12)
    s = 0.05
    rn = lambda k, shape: jax.random.normal(k, shape, jnp.float32) * s
    return {
        # block 1
        "wconv1": rn(ks[0], (KSIZE, d)),          # depthwise taps, (k, channel)
        "bconv1": rn(ks[1], (1, d)),
        "lnw1": jnp.ones((1, d), jnp.float32),
        "lnb1": jnp.zeros((1, d), jnp.float32),
        "w1_1": rn(ks[2], (d, H)),
        "b1_1": rn(ks[3], (1, H)),
        "w1_2": rn(ks[4], (H, d)),
        "b1_2": rn(ks[5], (1, d)),
        "gamma1": jnp.full((1, d), 1e-6, jnp.float32),
        # block 2
        "wconv2": rn(ks[6], (KSIZE, d)),
        "bconv2": rn(ks[7], (1, d)),
        "lnw2": jnp.ones((1, d), jnp.float32),
        "lnb2": jnp.zeros((1, d), jnp.float32),
        "w2_1": rn(ks[8], (d, H)),
        "b2_1": rn(ks[9], (1, H)),
        "w2_2": rn(ks[10], (H, d)),
        "b2_2": rn(ks[11], (1, d)),
        "gamma2": jnp.full((1, d), 1e-6, jnp.float32),
    }


if __name__ == "__main__":
    key = jax.random.PRNGKey(0)
    B, d, L = 2, 32, 16      # d_model = 32 (divisible by T=4), hidden 4d = 128
    N = 16                   # memory length (must equal L, see wrapper)
    qN = 10                  # module default

    k1, k2, k3 = jax.random.split(key, 3)
    tgt = jax.random.normal(k1, (B, d, L), jnp.float32)
    memory = jax.random.normal(k2, (B, d, N), jnp.float32)
    mask = jnp.broadcast_to(jnp.arange(L)[None, None, :] < L - 2, (B, 1, L))

    params = init_params(k3, d)

    fwd = jax.jit(functools.partial(deco_decoder_layer_forward, qN=qN))
    out, out_mask = fwd(tgt, memory, mask, params)
    jax.block_until_ready(out)

    assert out.shape == (B, d, qN), out.shape
    assert out.dtype == jnp.float32
    assert out_mask.shape == (B, 1, L) and out_mask.dtype == jnp.bool_
    print("KERNEL_OK")
</pallas_src>

<mosaic_0001>
module attributes {stable_mosaic.version = 11 : i64} {
  func.func @_fused_kernel(%arg0: i32, %arg1: memref<16x32xf32, #tpu.memory_space<vmem>>, %arg2: memref<16x32xf32, #tpu.memory_space<vmem>>, %arg3: memref<16x1xf32, #tpu.memory_space<vmem>>, %arg4: memref<16x1xf32, #tpu.memory_space<vmem>>, %arg5: memref<9x32xf32, #tpu.memory_space<vmem>>, %arg6: memref<1x32xf32, #tpu.memory_space<vmem>>, %arg7: memref<1x32xf32, #tpu.memory_space<vmem>>, %arg8: memref<1x32xf32, #tpu.memory_space<vmem>>, %arg9: memref<32x128xf32, #tpu.memory_space<vmem>>, %arg10: memref<1x128xf32, #tpu.memory_space<vmem>>, %arg11: memref<128x32xf32, #tpu.memory_space<vmem>>, %arg12: memref<1x32xf32, #tpu.memory_space<vmem>>, %arg13: memref<1x32xf32, #tpu.memory_space<vmem>>, %arg14: memref<9x32xf32, #tpu.memory_space<vmem>>, %arg15: memref<1x32xf32, #tpu.memory_space<vmem>>, %arg16: memref<1x32xf32, #tpu.memory_space<vmem>>, %arg17: memref<1x32xf32, #tpu.memory_space<vmem>>, %arg18: memref<32x128xf32, #tpu.memory_space<vmem>>, %arg19: memref<1x128xf32, #tpu.memory_space<vmem>>, %arg20: memref<128x32xf32, #tpu.memory_space<vmem>>, %arg21: memref<1x32xf32, #tpu.memory_space<vmem>>, %arg22: memref<1x32xf32, #tpu.memory_space<vmem>>, %arg23: memref<16x16xf32, #tpu.memory_space<vmem>>, %arg24: memref<16x32xf32, #tpu.memory_space<vmem>>) attributes {dimension_semantics = [#tpu.dimension_semantics<parallel>], iteration_bounds = array<i64: 2>, scalar_prefetch = 0 : i64, scratch_operands = 0 : i64, tpu.core_type = #tpu.core_type<tc>, window_params = [{transform_indices = @transform_0, window_bounds = array<i64: 16, 32>}, {transform_indices = @transform_1, window_bounds = array<i64: 16, 32>}, {transform_indices = @transform_2, window_bounds = array<i64: 16, 1>}, {transform_indices = @transform_3, window_bounds = array<i64: 16, 1>}, {pipeline_mode = #tpu.pipeline_mode<synchronous>, transform_indices = @transform_4, window_bounds = array<i64: 9, 32>}, {pipeline_mode = #tpu.pipeline_mode<synchronous>, transform_indices = @transform_5, window_bounds = array<i64: 1, 32>}, {pipeline_mode = #tpu.pipeline_mode<synchronous>, transform_indices = @transform_6, window_bounds = array<i64: 1, 32>}, {pipeline_mode = #tpu.pipeline_mode<synchronous>, transform_indices = @transform_7, window_bounds = array<i64: 1, 32>}, {pipeline_mode = #tpu.pipeline_mode<synchronous>, transform_indices = @transform_8, window_bounds = array<i64: 32, 128>}, {pipeline_mode = #tpu.pipeline_mode<synchronous>, transform_indices = @transform_9, window_bounds = array<i64: 1, 128>}, {pipeline_mode = #tpu.pipeline_mode<synchronous>, transform_indices = @transform_10, window_bounds = array<i64: 128, 32>}, {pipeline_mode = #tpu.pipeline_mode<synchronous>, transform_indices = @transform_11, window_bounds = array<i64: 1, 32>}, {pipeline_mode = #tpu.pipeline_mode<synchronous>, transform_indices = @transform_12, window_bounds = array<i64: 1, 32>}, {pipeline_mode = #tpu.pipeline_mode<synchronous>, transform_indices = @transform_13, window_bounds = array<i64: 9, 32>}, {pipeline_mode = #tpu.pipeline_mode<synchronous>, transform_indices = @transform_14, window_bounds = array<i64: 1, 32>}, {pipeline_mode = #tpu.pipeline_mode<synchronous>, transform_indices = @transform_15, window_bounds = array<i64: 1, 32>}, {pipeline_mode = #tpu.pipeline_mode<synchronous>, transform_indices = @transform_16, window_bounds = array<i64: 1, 32>}, {pipeline_mode = #tpu.pipeline_mode<synchronous>, transform_indices = @transform_17, window_bounds = array<i64: 32, 128>}, {pipeline_mode = #tpu.pipeline_mode<synchronous>, transform_indices = @transform_18, window_bounds = array<i64: 1, 128>}, {pipeline_mode = #tpu.pipeline_mode<synchronous>, transform_indices = @transform_19, window_bounds = array<i64: 128, 32>}, {pipeline_mode = #tpu.pipeline_mode<synchronous>, transform_indices = @transform_20, window_bounds = array<i64: 1, 32>}, {pipeline_mode = #tpu.pipeline_mode<synchronous>, transform_indices = @transform_21, window_bounds = array<i64: 1, 32>}, {pipeline_mode = #tpu.pipeline_mode<synchronous>, transform_indices = @transform_22, window_bounds = array<i64: 16, 16>}, {transform_indices = @transform_23, window_bounds = array<i64: 16, 32>}]} {
    %c0 = arith.constant 0 : index
    %c0_0 = arith.constant 0 : index
    %0 = vector.load %arg3[%c0, %c0_0] : memref<16x1xf32, #tpu.memory_space<vmem>>, vector<16x1xf32>
    %c0_1 = arith.constant 0 : index
    %c0_2 = arith.constant 0 : index
    %1 = vector.load %arg4[%c0_1, %c0_2] : memref<16x1xf32, #tpu.memory_space<vmem>>, vector<16x1xf32>
    %c0_3 = arith.constant 0 : index
    %c0_4 = arith.constant 0 : index
    %2 = vector.load %arg1[%c0_3, %c0_4] : memref<16x32xf32, #tpu.memory_space<vmem>>, vector<16x32xf32>
    %cst = arith.constant 2.000000e+00 : f32
    %3 = vector.broadcast %cst : f32 to vector<16x32xf32>
    %4 = arith.mulf %3, %2 : vector<16x32xf32>
    %cst_5 = arith.constant 0.000000e+00 : f32
    %5 = vector.broadcast %cst_5 : f32 to vector<16x32xf32>
    %c0_6 = arith.constant 0 : index
    %c0_7 = arith.constant 0 : index
    %6 = vector.load %arg6[%c0_6, %c0_7] : memref<1x32xf32, #tpu.memory_space<vmem>>, vector<1x32xf32>
    %7 = vector.broadcast %6 : vector<1x32xf32> to vector<16x32xf32>
    %8 = arith.addf %5, %7 : vector<16x32xf32>
    %c4_i32 = arith.constant 4 : i32
    %9 = tpu.dynamic_rotate %4 by %c4_i32 dim 0 : vector<16x32xf32>, i32 -> vector<16x32xf32>
    %c0_8 = arith.constant 0 : index
    %c0_9 = arith.constant 0 : index
    %10 = vector.load %arg5[%c0_8, %c0_9] : memref<9x32xf32, #tpu.memory_space<vmem>>, vector<1x32xf32>
    %11 = vector.broadcast %10 : vector<1x32xf32> to vector<16x32xf32>
    %12 = arith.mulf %9, %11 : vector<16x32xf32>
    %cst_10 = arith.constant -3.000000e+00 : f32
    %13 = vector.broadcast %cst_10 : f32 to vector<16x1xf32>
    %14 = arith.addf %1, %13 : vector<16x1xf32>
    %cst_11 = arith.constant 0.000000e+00 : f32
    %cst_12 = arith.constant 1.000000e+00 : f32
    %15 = vector.broadcast %cst_11 : f32 to vector<16x1xf32>
    %16 = arith.maximumf %15, %14 : vector<16x1xf32>
    %17 = vector.broadcast %cst_12 : f32 to vector<16x1xf32>
    %18 = arith.minimumf %17, %16 : vector<16x1xf32>
    %19 = vector.broadcast %18 : vector<16x1xf32> to vector<16x32xf32>
    %20 = arith.mulf %12, %19 : vector<16x32xf32>
    %21 = arith.addf %8, %20 : vector<16x32xf32>
    %c3_i32 = arith.constant 3 : i32
    %22 = tpu.dynamic_rotate %4 by %c3_i32 dim 0 : vector<16x32xf32>, i32 -> vector<16x32xf32>
    %c1 = arith.constant 1 : index
    %c0_13 = arith.constant 0 : index
    %23 = vector.load %arg5[%c1, %c0_13] : memref<9x32xf32, #tpu.memory_space<vmem>>, vector<1x32xf32>
    %24 = vector.broadcast %23 : vector<1x32xf32> to vector<16x32xf32>
    %25 = arith.mulf %22, %24 : vector<16x32xf32>
    %cst_14 = arith.constant -2.000000e+00 : f32
    %26 = vector.broadcast %cst_14 : f32 to vector<16x1xf32>
    %27 = arith.addf %1, %26 : vector<16x1xf32>
    %cst_15 = arith.constant 0.000000e+00 : f32
    %cst_16 = arith.constant 1.000000e+00 : f32
    %28 = vector.broadcast %cst_15 : f32 to vector<16x1xf32>
    %29 = arith.maximumf %28, %27 : vector<16x1xf32>
    %30 = vector.broadcast %cst_16 : f32 to vector<16x1xf32>
    %31 = arith.minimumf %30, %29 : vector<16x1xf32>
    %32 = vector.broadcast %31 : vector<16x1xf32> to vector<16x32xf32>
    %33 = arith.mulf %25, %32 : vector<16x32xf32>
    %34 = arith.addf %21, %33 : vector<16x32xf32>
    %c2_i32 = arith.constant 2 : i32
    %35 = tpu.dynamic_rotate %4 by %c2_i32 dim 0 : vector<16x32xf32>, i32 -> vector<16x32xf32>
    %c2 = arith.constant 2 : index
    %c0_17 = arith.constant 0 : index
    %36 = vector.load %arg5[%c2, %c0_17] : memref<9x32xf32, #tpu.memory_space<vmem>>, vector<1x32xf32>
    %37 = vector.broadcast %36 : vector<1x32xf32> to vector<16x32xf32>
    %38 = arith.mulf %35, %37 : vector<16x32xf32>
    %cst_18 = arith.constant -1.000000e+00 : f32
    %39 = vector.broadcast %cst_18 : f32 to vector<16x1xf32>
    %40 = arith.addf %1, %39 : vector<16x1xf32>
    %cst_19 = arith.constant 0.000000e+00 : f32
    %cst_20 = arith.constant 1.000000e+00 : f32
    %41 = vector.broadcast %cst_19 : f32 to vector<16x1xf32>
    %42 = arith.maximumf %41, %40 : vector<16x1xf32>
    %43 = vector.broadcast %cst_20 : f32 to vector<16x1xf32>
    %44 = arith.minimumf %43, %42 : vector<16x1xf32>
    %45 = vector.broadcast %44 : vector<16x1xf32> to vector<16x32xf32>
    %46 = arith.mulf %38, %45 : vector<16x32xf32>
    %47 = arith.addf %34, %46 : vector<16x32xf32>
    %c1_i32 = arith.constant 1 : i32
    %48 = tpu.dynamic_rotate %4 by %c1_i32 dim 0 : vector<16x32xf32>, i32 -> vector<16x32xf32>
    %c3 = arith.constant 3 : index
    %c0_21 = arith.constant 0 : index
    %49 = vector.load %arg5[%c3, %c0_21] : memref<9x32xf32, #tpu.memory_space<vmem>>, vector<1x32xf32>
    %50 = vector.broadcast %49 : vector<1x32xf32> to vector<16x32xf32>
    %51 = arith.mulf %48, %50 : vector<16x32xf32>
    %cst_22 = arith.constant 0.000000e+00 : f32
    %52 = vector.broadcast %cst_22 : f32 to vector<16x1xf32>
    %53 = arith.addf %1, %52 : vector<16x1xf32>
    %cst_23 = arith.constant 0.000000e+00 : f32
    %cst_24 = arith.constant 1.000000e+00 : f32
    %54 = vector.broadcast %cst_23 : f32 to vector<16x1xf32>
    %55 = arith.maximumf %54, %53 : vector<16x1xf32>
    %56 = vector.broadcast %cst_24 : f32 to vector<16x1xf32>
    %57 = arith.minimumf %56, %55 : vector<16x1xf32>
    %58 = vector.broadcast %57 : vector<16x1xf32> to vector<16x32xf32>
    %59 = arith.mulf %51, %58 : vector<16x32xf32>
    %60 = arith.addf %47, %59 : vector<16x32xf32>
    %c4 = arith.constant 4 : index
    %c0_25 = arith.constant 0 : index
    %61 = vector.load %arg5[%c4, %c0_25] : memref<9x32xf32, #tpu.memory_space<vmem>>, vector<1x32xf32>
    %62 = vector.broadcast %61 : vector<1x32xf32> to vector<16x32xf32>
    %63 = arith.mulf %4, %62 : vector<16x32xf32>
    %64 = arith.addf %60, %63 : vector<16x32xf32>
    %c15_i32 = arith.constant 15 : i32
    %65 = tpu.dynamic_rotate %4 by %c15_i32 dim 0 : vector<16x32xf32>, i32 -> vector<16x32xf32>
    %c5 = arith.constant 5 : index
    %c0_26 = arith.constant 0 : index
    %66 = vector.load %arg5[%c5, %c0_26] : memref<9x32xf32, #tpu.memory_space<vmem>>, vector<1x32xf32>
    %67 = vector.broadcast %66 : vector<1x32xf32> to vector<16x32xf32>
    %68 = arith.mulf %65, %67 : vector<16x32xf32>
    %cst_27 = arith.constant 1.500000e+01 : f32
    %69 = vector.broadcast %cst_27 : f32 to vector<16x1xf32>
    %70 = arith.subf %69, %1 : vector<16x1xf32>
    %cst_28 = arith.constant 0.000000e+00 : f32
    %cst_29 = arith.constant 1.000000e+00 : f32
    %71 = vector.broadcast %cst_28 : f32 to vector<16x1xf32>
    %72 = arith.maximumf %71, %70 : vector<16x1xf32>
    %73 = vector.broadcast %cst_29 : f32 to vector<16x1xf32>
    %74 = arith.minimumf %73, %72 : vector<16x1xf32>
    %75 = vector.broadcast %74 : vector<16x1xf32> to vector<16x32xf32>
    %76 = arith.mulf %68, %75 : vector<16x32xf32>
    %77 = arith.addf %64, %76 : vector<16x32xf32>
    %c14_i32 = arith.constant 14 : i32
    %78 = tpu.dynamic_rotate %4 by %c14_i32 dim 0 : vector<16x32xf32>, i32 -> vector<16x32xf32>
    %c6 = arith.constant 6 : index
    %c0_30 = arith.constant 0 : index
    %79 = vector.load %arg5[%c6, %c0_30] : memref<9x32xf32, #tpu.memory_space<vmem>>, vector<1x32xf32>
    %80 = vector.broadcast %79 : vector<1x32xf32> to vector<16x32xf32>
    %81 = arith.mulf %78, %80 : vector<16x32xf32>
    %cst_31 = arith.constant 1.400000e+01 : f32
    %82 = vector.broadcast %cst_31 : f32 to vector<16x1xf32>
    %83 = arith.subf %82, %1 : vector<16x1xf32>
    %cst_32 = arith.constant 0.000000e+00 : f32
    %cst_33 = arith.constant 1.000000e+00 : f32
    %84 = vector.broadcast %cst_32 : f32 to vector<16x1xf32>
    %85 = arith.maximumf %84, %83 : vector<16x1xf32>
    %86 = vector.broadcast %cst_33 : f32 to vector<16x1xf32>
    %87 = arith.minimumf %86, %85 : vector<16x1xf32>
    %88 = vector.broadcast %87 : vector<16x1xf32> to vector<16x32xf32>
    %89 = arith.mulf %81, %88 : vector<16x32xf32>
    %90 = arith.addf %77, %89 : vector<16x32xf32>
    %c13_i32 = arith.constant 13 : i32
    %91 = tpu.dynamic_rotate %4 by %c13_i32 dim 0 : vector<16x32xf32>, i32 -> vector<16x32xf32>
    %c7 = arith.constant 7 : index
    %c0_34 = arith.constant 0 : index
    %92 = vector.load %arg5[%c7, %c0_34] : memref<9x32xf32, #tpu.memory_space<vmem>>, vector<1x32xf32>
    %93 = vector.broadcast %92 : vector<1x32xf32> to vector<16x32xf32>
    %94 = arith.mulf %91, %93 : vector<16x32xf32>
    %cst_35 = arith.constant 1.300000e+01 : f32
    %95 = vector.broadcast %cst_35 : f32 to vector<16x1xf32>
    %96 = arith.subf %95, %1 : vector<16x1xf32>
    %cst_36 = arith.constant 0.000000e+00 : f32
    %cst_37 = arith.constant 1.000000e+00 : f32
    %97 = vector.broadcast %cst_36 : f32 to vector<16x1xf32>
    %98 = arith.maximumf %97, %96 : vector<16x1xf32>
    %99 = vector.broadcast %cst_37 : f32 to vector<16x1xf32>
    %100 = arith.minimumf %99, %98 : vector<16x1xf32>
    %101 = vector.broadcast %100 : vector<16x1xf32> to vector<16x32xf32>
    %102 = arith.mulf %94, %101 : vector<16x32xf32>
    %103 = arith.addf %90, %102 : vector<16x32xf32>
    %c12_i32 = arith.constant 12 : i32
    %104 = tpu.dynamic_rotate %4 by %c12_i32 dim 0 : vector<16x32xf32>, i32 -> vector<16x32xf32>
    %c8 = arith.constant 8 : index
    %c0_38 = arith.constant 0 : index
    %105 = vector.load %arg5[%c8, %c0_38] : memref<9x32xf32, #tpu.memory_space<vmem>>, vector<1x32xf32>
    %106 = vector.broadcast %105 : vector<1x32xf32> to vector<16x32xf32>
    %107 = arith.mulf %104, %106 : vector<16x32xf32>
    %cst_39 = arith.constant 1.200000e+01 : f32
    %108 = vector.broadcast %cst_39 : f32 to vector<16x1xf32>
    %109 = arith.subf %108, %1 : vector<16x1xf32>
    %cst_40 = arith.constant 0.000000e+00 : f32
    %cst_41 = arith.constant 1.000000e+00 : f32
    %110 = vector.broadcast %cst_40 : f32 to vector<16x1xf32>
    %111 = arith.maximumf %110, %109 : vector<16x1xf32>
    %112 = vector.broadcast %cst_41 : f32 to vector<16x1xf32>
    %113 = arith.minimumf %112, %111 : vector<16x1xf32>
    %114 = vector.broadcast %113 : vector<16x1xf32> to vector<16x32xf32>
    %115 = arith.mulf %107, %114 : vector<16x32xf32>
    %116 = arith.addf %103, %115 : vector<16x32xf32>
    %117 = vector.broadcast %0 : vector<16x1xf32> to vector<16x32xf32>
    %118 = arith.mulf %116, %117 : vector<16x32xf32>
    %cst_42 = arith.constant dense<0.000000e+00> : vector<16xf32>
    %119 = vector.multi_reduction <add>, %118, %cst_42 [1] : vector<16x32xf32> to vector<16xf32>
    %120 = vector.shape_cast %119 : vector<16xf32> to vector<16x1xf32>
    %cst_43 = arith.constant 3.200000e+01 : f32
    %121 = vector.broadcast %cst_43 : f32 to vector<16x1xf32>
    %122 = arith.divf %120, %121 : vector<16x1xf32>
    %123 = vector.broadcast %122 : vector<16x1xf32> to vector<16x32xf32>
    %124 = arith.subf %118, %123 : vector<16x32xf32>
    %125 = arith.mulf %124, %124 : vector<16x32xf32>
    %cst_44 = arith.constant dense<0.000000e+00> : vector<16xf32>
    %126 = vector.multi_reduction <add>, %125, %cst_44 [1] : vector<16x32xf32> to vector<16xf32>
    %127 = vector.shape_cast %126 : vector<16xf32> to vector<16x1xf32>
    %cst_45 = arith.constant 3.200000e+01 : f32
    %128 = vector.broadcast %cst_45 : f32 to vector<16x1xf32>
    %129 = arith.divf %127, %128 : vector<16x1xf32>
    %130 = vector.broadcast %122 : vector<16x1xf32> to vector<16x32xf32>
    %131 = arith.subf %118, %130 : vector<16x32xf32>
    %cst_46 = arith.constant 9.99999997E-7 : f32
    %132 = vector.broadcast %cst_46 : f32 to vector<16x1xf32>
    %133 = arith.addf %129, %132 : vector<16x1xf32>
    %134 = math.rsqrt %133 : vector<16x1xf32>
    %135 = vector.broadcast %134 : vector<16x1xf32> to vector<16x32xf32>
    %136 = arith.mulf %131, %135 : vector<16x32xf32>
    %c0_47 = arith.constant 0 : index
    %c0_48 = arith.constant 0 : index
    %137 = vector.load %arg7[%c0_47, %c0_48] : memref<1x32xf32, #tpu.memory_space<vmem>>, vector<1x32xf32>
    %138 = vector.broadcast %137 : vector<1x32xf32> to vector<16x32xf32>
    %139 = arith.mulf %136, %138 : vector<16x32xf32>
    %c0_49 = arith.constant 0 : index
    %c0_50 = arith.constant 0 : index
    %140 = vector.load %arg8[%c0_49, %c0_50] : memref<1x32xf32, #tpu.memory_space<vmem>>, vector<1x32xf32>
    %141 = vector.broadcast %140 : vector<1x32xf32> to vector<16x32xf32>
    %142 = arith.addf %139, %141 : vector<16x32xf32>
    %143 = arith.truncf %142 : vector<16x32xf32> to vector<16x32xbf16>
    %c0_51 = arith.constant 0 : index
    %c0_52 = arith.constant 0 : index
    %144 = vector.load %arg9[%c0_51, %c0_52] : memref<32x128xf32, #tpu.memory_space<vmem>>, vector<32x128xf32>
    %145 = arith.truncf %144 : vector<32x128xf32> to vector<32x128xbf16>
    %cst_53 = arith.constant dense<0.000000e+00> : vector<16x128xf32>
    %146 = tpu.matmul %143, %145, %cst_53 {dimension_numbers = #tpu.dot_dimension_numbers<[1], [0], [0], [1], [0, 0, 1, 1], [], []>} : vector<16x32xbf16>, vector<32x128xbf16>, vector<16x128xf32> -> vector<16x128xf32>
    %c0_54 = arith.constant 0 : index
    %c0_55 = arith.constant 0 : index
    %147 = vector.load %arg10[%c0_54, %c0_55] : memref<1x128xf32, #tpu.memory_space<vmem>>, vector<1x128xf32>
    %148 = vector.broadcast %147 : vector<1x128xf32> to vector<16x128xf32>
    %149 = arith.addf %146, %148 : vector<16x128xf32>
    %cst_56 = arith.constant 5.000000e-01 : f32
    %150 = vector.broadcast %cst_56 : f32 to vector<16x128xf32>
    %151 = arith.mulf %150, %149 : vector<16x128xf32>
    %cst_57 = arith.constant 0.707106769 : f32
    %152 = vector.broadcast %cst_57 : f32 to vector<16x128xf32>
    %153 = arith.mulf %149, %152 : vector<16x128xf32>
    %154 = math.erf %153 : vector<16x128xf32>
    %cst_58 = arith.constant 1.000000e+00 : f32
    %155 = vector.broadcast %cst_58 : f32 to vector<16x128xf32>
    %156 = arith.addf %155, %154 : vector<16x128xf32>
    %157 = arith.mulf %151, %156 : vector<16x128xf32>
    %158 = arith.truncf %157 : vector<16x128xf32> to vector<16x128xbf16>
    %c0_59 = arith.constant 0 : index
    %c0_60 = arith.constant 0 : index
    %159 = vector.load %arg11[%c0_59, %c0_60] : memref<128x32xf32, #tpu.memory_space<vmem>>, vector<128x32xf32>
    %160 = arith.truncf %159 : vector<128x32xf32> to vector<128x32xbf16>
    %cst_61 = arith.constant dense<0.000000e+00> : vector<16x32xf32>
    %161 = tpu.matmul %158, %160, %cst_61 {dimension_numbers = #tpu.dot_dimension_numbers<[1], [0], [0], [1], [0, 0, 1, 1], [], []>} : vector<16x128xbf16>, vector<128x32xbf16>, vector<16x32xf32> -> vector<16x32xf32>
    %c0_62 = arith.constant 0 : index
    %c0_63 = arith.constant 0 : index
    %162 = vector.load %arg12[%c0_62, %c0_63] : memref<1x32xf32, #tpu.memory_space<vmem>>, vector<1x32xf32>
    %163 = vector.broadcast %162 : vector<1x32xf32> to vector<16x32xf32>
    %164 = arith.addf %161, %163 : vector<16x32xf32>
    %c0_64 = arith.constant 0 : index
    %c0_65 = arith.constant 0 : index
    %165 = vector.load %arg13[%c0_64, %c0_65] : memref<1x32xf32, #tpu.memory_space<vmem>>, vector<1x32xf32>
    %166 = vector.broadcast %165 : vector<1x32xf32> to vector<16x32xf32>
    %167 = arith.mulf %164, %166 : vector<16x32xf32>
    %168 = arith.addf %4, %167 : vector<16x32xf32>
    %c0_66 = arith.constant 0 : index
    %c0_67 = arith.constant 0 : index
    %169 = vector.load %arg2[%c0_66, %c0_67] : memref<16x32xf32, #tpu.memory_space<vmem>>, vector<16x32xf32>
    %170 = arith.addf %168, %169 : vector<16x32xf32>
    %cst_68 = arith.constant 0.000000e+00 : f32
    %171 = vector.broadcast %cst_68 : f32 to vector<16x32xf32>
    %c0_69 = arith.constant 0 : index
    %c0_70 = arith.constant 0 : index
    %172 = vector.load %arg15[%c0_69, %c0_70] : memref<1x32xf32, #tpu.memory_space<vmem>>, vector<1x32xf32>
    %173 = vector.broadcast %172 : vector<1x32xf32> to vector<16x32xf32>
    %174 = arith.addf %171, %173 : vector<16x32xf32>
    %c4_i32_71 = arith.constant 4 : i32
    %175 = tpu.dynamic_rotate %170 by %c4_i32_71 dim 0 : vector<16x32xf32>, i32 -> vector<16x32xf32>
    %c0_72 = arith.constant 0 : index
    %c0_73 = arith.constant 0 : index
    %176 = vector.load %arg14[%c0_72, %c0_73] : memref<9x32xf32, #tpu.memory_space<vmem>>, vector<1x32xf32>
    %177 = vector.broadcast %176 : vector<1x32xf32> to vector<16x32xf32>
    %178 = arith.mulf %175, %177 : vector<16x32xf32>
    %cst_74 = arith.constant -3.000000e+00 : f32
    %179 = vector.broadcast %cst_74 : f32 to vector<16x1xf32>
    %180 = arith.addf %1, %179 : vector<16x1xf32>
    %cst_75 = arith.constant 0.000000e+00 : f32
    %cst_76 = arith.constant 1.000000e+00 : f32
    %181 = vector.broadcast %cst_75 : f32 to vector<16x1xf32>
    %182 = arith.maximumf %181, %180 : vector<16x1xf32>
    %183 = vector.broadcast %cst_76 : f32 to vector<16x1xf32>
    %184 = arith.minimumf %183, %182 : vector<16x1xf32>
    %185 = vector.broadcast %184 : vector<16x1xf32> to vector<16x32xf32>
    %186 = arith.mulf %178, %185 : vector<16x32xf32>
    %187 = arith.addf %174, %186 : vector<16x32xf32>
    %c3_i32_77 = arith.constant 3 : i32
    %188 = tpu.dynamic_rotate %170 by %c3_i32_77 dim 0 : vector<16x32xf32>, i32 -> vector<16x32xf32>
    %c1_78 = arith.constant 1 : index
    %c0_79 = arith.constant 0 : index
    %189 = vector.load %arg14[%c1_78, %c0_79] : memref<9x32xf32, #tpu.memory_space<vmem>>, vector<1x32xf32>
    %190 = vector.broadcast %189 : vector<1x32xf32> to vector<16x32xf32>
    %191 = arith.mulf %188, %190 : vector<16x32xf32>
    %cst_80 = arith.constant -2.000000e+00 : f32
    %192 = vector.broadcast %cst_80 : f32 to vector<16x1xf32>
    %193 = arith.addf %1, %192 : vector<16x1xf32>
    %cst_81 = arith.constant 0.000000e+00 : f32
    %cst_82 = arith.constant 1.000000e+00 : f32
    %194 = vector.broadcast %cst_81 : f32 to vector<16x1xf32>
    %195 = arith.maximumf %194, %193 : vector<16x1xf32>
    %196 = vector.broadcast %cst_82 : f32 to vector<16x1xf32>
    %197 = arith.minimumf %196, %195 : vector<16x1xf32>
    %198 = vector.broadcast %197 : vector<16x1xf32> to vector<16x32xf32>
    %199 = arith.mulf %191, %198 : vector<16x32xf32>
    %200 = arith.addf %187, %199 : vector<16x32xf32>
    %c2_i32_83 = arith.constant 2 : i32
    %201 = tpu.dynamic_rotate %170 by %c2_i32_83 dim 0 : vector<16x32xf32>, i32 -> vector<16x32xf32>
    %c2_84 = arith.constant 2 : index
    %c0_85 = arith.constant 0 : index
    %202 = vector.load %arg14[%c2_84, %c0_85] : memref<9x32xf32, #tpu.memory_space<vmem>>, vector<1x32xf32>
    %203 = vector.broadcast %202 : vector<1x32xf32> to vector<16x32xf32>
    %204 = arith.mulf %201, %203 : vector<16x32xf32>
    %cst_86 = arith.constant -1.000000e+00 : f32
    %205 = vector.broadcast %cst_86 : f32 to vector<16x1xf32>
    %206 = arith.addf %1, %205 : vector<16x1xf32>
    %cst_87 = arith.constant 0.000000e+00 : f32
    %cst_88 = arith.constant 1.000000e+00 : f32
    %207 = vector.broadcast %cst_87 : f32 to vector<16x1xf32>
    %208 = arith.maximumf %207, %206 : vector<16x1xf32>
    %209 = vector.broadcast %cst_88 : f32 to vector<16x1xf32>
    %210 = arith.minimumf %209, %208 : vector<16x1xf32>
    %211 = vector.broadcast %210 : vector<16x1xf32> to vector<16x32xf32>
    %212 = arith.mulf %204, %211 : vector<16x32xf32>
    %213 = arith.addf %200, %212 : vector<16x32xf32>
    %c1_i32_89 = arith.constant 1 : i32
    %214 = tpu.dynamic_rotate %170 by %c1_i32_89 dim 0 : vector<16x32xf32>, i32 -> vector<16x32xf32>
    %c3_90 = arith.constant 3 : index
    %c0_91 = arith.constant 0 : index
    %215 = vector.load %arg14[%c3_90, %c0_91] : memref<9x32xf32, #tpu.memory_space<vmem>>, vector<1x32xf32>
    %216 = vector.broadcast %215 : vector<1x32xf32> to vector<16x32xf32>
    %217 = arith.mulf %214, %216 : vector<16x32xf32>
    %cst_92 = arith.constant 0.000000e+00 : f32
    %218 = vector.broadcast %cst_92 : f32 to vector<16x1xf32>
    %219 = arith.addf %1, %218 : vector<16x1xf32>
    %cst_93 = arith.constant 0.000000e+00 : f32
    %cst_94 = arith.constant 1.000000e+00 : f32
    %220 = vector.broadcast %cst_93 : f32 to vector<16x1xf32>
    %221 = arith.maximumf %220, %219 : vector<16x1xf32>
    %222 = vector.broadcast %cst_94 : f32 to vector<16x1xf32>
    %223 = arith.minimumf %222, %221 : vector<16x1xf32>
    %224 = vector.broadcast %223 : vector<16x1xf32> to vector<16x32xf32>
    %225 = arith.mulf %217, %224 : vector<16x32xf32>
    %226 = arith.addf %213, %225 : vector<16x32xf32>
    %c4_95 = arith.constant 4 : index
    %c0_96 = arith.constant 0 : index
    %227 = vector.load %arg14[%c4_95, %c0_96] : memref<9x32xf32, #tpu.memory_space<vmem>>, vector<1x32xf32>
    %228 = vector.broadcast %227 : vector<1x32xf32> to vector<16x32xf32>
    %229 = arith.mulf %170, %228 : vector<16x32xf32>
    %230 = arith.addf %226, %229 : vector<16x32xf32>
    %c15_i32_97 = arith.constant 15 : i32
    %231 = tpu.dynamic_rotate %170 by %c15_i32_97 dim 0 : vector<16x32xf32>, i32 -> vector<16x32xf32>
    %c5_98 = arith.constant 5 : index
    %c0_99 = arith.constant 0 : index
    %232 = vector.load %arg14[%c5_98, %c0_99] : memref<9x32xf32, #tpu.memory_space<vmem>>, vector<1x32xf32>
    %233 = vector.broadcast %232 : vector<1x32xf32> to vector<16x32xf32>
    %234 = arith.mulf %231, %233 : vector<16x32xf32>
    %cst_100 = arith.constant 1.500000e+01 : f32
    %235 = vector.broadcast %cst_100 : f32 to vector<16x1xf32>
    %236 = arith.subf %235, %1 : vector<16x1xf32>
    %cst_101 = arith.constant 0.000000e+00 : f32
    %cst_102 = arith.constant 1.000000e+00 : f32
    %237 = vector.broadcast %cst_101 : f32 to vector<16x1xf32>
    %238 = arith.maximumf %237, %236 : vector<16x1xf32>
    %239 = vector.broadcast %cst_102 : f32 to vector<16x1xf32>
    %240 = arith.minimumf %239, %238 : vector<16x1xf32>
    %241 = vector.broadcast %240 : vector<16x1xf32> to vector<16x32xf32>
    %242 = arith.mulf %234, %241 : vector<16x32xf32>
    %243 = arith.addf %230, %242 : vector<16x32xf32>
    %c14_i32_103 = arith.constant 14 : i32
    %244 = tpu.dynamic_rotate %170 by %c14_i32_103 dim 0 : vector<16x32xf32>, i32 -> vector<16x32xf32>
    %c6_104 = arith.constant 6 : index
    %c0_105 = arith.constant 0 : index
    %245 = vector.load %arg14[%c6_104, %c0_105] : memref<9x32xf32, #tpu.memory_space<vmem>>, vector<1x32xf32>
    %246 = vector.broadcast %245 : vector<1x32xf32> to vector<16x32xf32>
    %247 = arith.mulf %244, %246 : vector<16x32xf32>
    %cst_106 = arith.constant 1.400000e+01 : f32
    %248 = vector.broadcast %cst_106 : f32 to vector<16x1xf32>
    %249 = arith.subf %248, %1 : vector<16x1xf32>
    %cst_107 = arith.constant 0.000000e+00 : f32
    %cst_108 = arith.constant 1.000000e+00 : f32
    %250 = vector.broadcast %cst_107 : f32 to vector<16x1xf32>
    %251 = arith.maximumf %250, %249 : vector<16x1xf32>
    %252 = vector.broadcast %cst_108 : f32 to vector<16x1xf32>
    %253 = arith.minimumf %252, %251 : vector<16x1xf32>
    %254 = vector.broadcast %253 : vector<16x1xf32> to vector<16x32xf32>
    %255 = arith.mulf %247, %254 : vector<16x32xf32>
    %256 = arith.addf %243, %255 : vector<16x32xf32>
    %c13_i32_109 = arith.constant 13 : i32
    %257 = tpu.dynamic_rotate %170 by %c13_i32_109 dim 0 : vector<16x32xf32>, i32 -> vector<16x32xf32>
    %c7_110 = arith.constant 7 : index
    %c0_111 = arith.constant 0 : index
    %258 = vector.load %arg14[%c7_110, %c0_111] : memref<9x32xf32, #tpu.memory_space<vmem>>, vector<1x32xf32>
    %259 = vector.broadcast %258 : vector<1x32xf32> to vector<16x32xf32>
    %260 = arith.mulf %257, %259 : vector<16x32xf32>
    %cst_112 = arith.constant 1.300000e+01 : f32
    %261 = vector.broadcast %cst_112 : f32 to vector<16x1xf32>
    %262 = arith.subf %261, %1 : vector<16x1xf32>
    %cst_113 = arith.constant 0.000000e+00 : f32
    %cst_114 = arith.constant 1.000000e+00 : f32
    %263 = vector.broadcast %cst_113 : f32 to vector<16x1xf32>
    %264 = arith.maximumf %263, %262 : vector<16x1xf32>
    %265 = vector.broadcast %cst_114 : f32 to vector<16x1xf32>
    %266 = arith.minimumf %265, %264 : vector<16x1xf32>
    %267 = vector.broadcast %266 : vector<16x1xf32> to vector<16x32xf32>
    %268 = arith.mulf %260, %267 : vector<16x32xf32>
    %269 = arith.addf %256, %268 : vector<16x32xf32>
    %c12_i32_115 = arith.constant 12 : i32
    %270 = tpu.dynamic_rotate %170 by %c12_i32_115 dim 0 : vector<16x32xf32>, i32 -> vector<16x32xf32>
    %c8_116 = arith.constant 8 : index
    %c0_117 = arith.constant 0 : index
    %271 = vector.load %arg14[%c8_116, %c0_117] : memref<9x32xf32, #tpu.memory_space<vmem>>, vector<1x32xf32>
    %272 = vector.broadcast %271 : vector<1x32xf32> to vector<16x32xf32>
    %273 = arith.mulf %270, %272 : vector<16x32xf32>
    %cst_118 = arith.constant 1.200000e+01 : f32
    %274 = vector.broadcast %cst_118 : f32 to vector<16x1xf32>
    %275 = arith.subf %274, %1 : vector<16x1xf32>
    %cst_119 = arith.constant 0.000000e+00 : f32
    %cst_120 = arith.constant 1.000000e+00 : f32
    %276 = vector.broadcast %cst_119 : f32 to vector<16x1xf32>
    %277 = arith.maximumf %276, %275 : vector<16x1xf32>
    %278 = vector.broadcast %cst_120 : f32 to vector<16x1xf32>
    %279 = arith.minimumf %278, %277 : vector<16x1xf32>
    %280 = vector.broadcast %279 : vector<16x1xf32> to vector<16x32xf32>
    %281 = arith.mulf %273, %280 : vector<16x32xf32>
    %282 = arith.addf %269, %281 : vector<16x32xf32>
    %283 = vector.broadcast %0 : vector<16x1xf32> to vector<16x32xf32>
    %284 = arith.mulf %282, %283 : vector<16x32xf32>
    %285 = arith.addf %284, %168 : vector<16x32xf32>
    %cst_121 = arith.constant dense<0.000000e+00> : vector<16xf32>
    %286 = vector.multi_reduction <add>, %285, %cst_121 [1] : vector<16x32xf32> to vector<16xf32>
    %287 = vector.shape_cast %286 : vector<16xf32> to vector<16x1xf32>
    %cst_122 = arith.constant 3.200000e+01 : f32
    %288 = vector.broadcast %cst_122 : f32 to vector<16x1xf32>
    %289 = arith.divf %287, %288 : vector<16x1xf32>
    %290 = vector.broadcast %289 : vector<16x1xf32> to vector<16x32xf32>
    %291 = arith.subf %285, %290 : vector<16x32xf32>
    %292 = arith.mulf %291, %291 : vector<16x32xf32>
    %cst_123 = arith.constant dense<0.000000e+00> : vector<16xf32>
    %293 = vector.multi_reduction <add>, %292, %cst_123 [1] : vector<16x32xf32> to vector<16xf32>
    %294 = vector.shape_cast %293 : vector<16xf32> to vector<16x1xf32>
    %cst_124 = arith.constant 3.200000e+01 : f32
    %295 = vector.broadcast %cst_124 : f32 to vector<16x1xf32>
    %296 = arith.divf %294, %295 : vector<16x1xf32>
    %297 = vector.broadcast %289 : vector<16x1xf32> to vector<16x32xf32>
    %298 = arith.subf %285, %297 : vector<16x32xf32>
    %cst_125 = arith.constant 9.99999997E-7 : f32
    %299 = vector.broadcast %cst_125 : f32 to vector<16x1xf32>
    %300 = arith.addf %296, %299 : vector<16x1xf32>
    %301 = math.rsqrt %300 : vector<16x1xf32>
    %302 = vector.broadcast %301 : vector<16x1xf32> to vector<16x32xf32>
    %303 = arith.mulf %298, %302 : vector<16x32xf32>
    %c0_126 = arith.constant 0 : index
    %c0_127 = arith.constant 0 : index
    %304 = vector.load %arg16[%c0_126, %c0_127] : memref<1x32xf32, #tpu.memory_space<vmem>>, vector<1x32xf32>
    %305 = vector.broadcast %304 : vector<1x32xf32> to vector<16x32xf32>
    %306 = arith.mulf %303, %305 : vector<16x32xf32>
    %c0_128 = arith.constant 0 : index
    %c0_129 = arith.constant 0 : index
    %307 = vector.load %arg17[%c0_128, %c0_129] : memref<1x32xf32, #tpu.memory_space<vmem>>, vector<1x32xf32>
    %308 = vector.broadcast %307 : vector<1x32xf32> to vector<16x32xf32>
    %309 = arith.addf %306, %308 : vector<16x32xf32>
    %310 = arith.truncf %309 : vector<16x32xf32> to vector<16x32xbf16>
    %c0_130 = arith.constant 0 : index
    %c0_131 = arith.constant 0 : index
    %311 = vector.load %arg18[%c0_130, %c0_131] : memref<32x128xf32, #tpu.memory_space<vmem>>, vector<32x128xf32>
    %312 = arith.truncf %311 : vector<32x128xf32> to vector<32x128xbf16>
    %cst_132 = arith.constant dense<0.000000e+00> : vector<16x128xf32>
    %313 = tpu.matmul %310, %312, %cst_132 {dimension_numbers = #tpu.dot_dimension_numbers<[1], [0], [0], [1], [0, 0, 1, 1], [], []>} : vector<16x32xbf16>, vector<32x128xbf16>, vector<16x128xf32> -> vector<16x128xf32>
    %c0_133 = arith.constant 0 : index
    %c0_134 = arith.constant 0 : index
    %314 = vector.load %arg19[%c0_133, %c0_134] : memref<1x128xf32, #tpu.memory_space<vmem>>, vector<1x128xf32>
    %315 = vector.broadcast %314 : vector<1x128xf32> to vector<16x128xf32>
    %316 = arith.addf %313, %315 : vector<16x128xf32>
    %cst_135 = arith.constant 5.000000e-01 : f32
    %317 = vector.broadcast %cst_135 : f32 to vector<16x128xf32>
    %318 = arith.mulf %317, %316 : vector<16x128xf32>
    %cst_136 = arith.constant 0.707106769 : f32
    %319 = vector.broadcast %cst_136 : f32 to vector<16x128xf32>
    %320 = arith.mulf %316, %319 : vector<16x128xf32>
    %321 = math.erf %320 : vector<16x128xf32>
    %cst_137 = arith.constant 1.000000e+00 : f32
    %322 = vector.broadcast %cst_137 : f32 to vector<16x128xf32>
    %323 = arith.addf %322, %321 : vector<16x128xf32>
    %324 = arith.mulf %318, %323 : vector<16x128xf32>
    %325 = arith.truncf %324 : vector<16x128xf32> to vector<16x128xbf16>
    %c0_138 = arith.constant 0 : index
    %c0_139 = arith.constant 0 : index
    %326 = vector.load %arg20[%c0_138, %c0_139] : memref<128x32xf32, #tpu.memory_space<vmem>>, vector<128x32xf32>
    %327 = arith.truncf %326 : vector<128x32xf32> to vector<128x32xbf16>
    %cst_140 = arith.constant dense<0.000000e+00> : vector<16x32xf32>
    %328 = tpu.matmul %325, %327, %cst_140 {dimension_numbers = #tpu.dot_dimension_numbers<[1], [0], [0], [1], [0, 0, 1, 1], [], []>} : vector<16x128xbf16>, vector<128x32xbf16>, vector<16x32xf32> -> vector<16x32xf32>
    %c0_141 = arith.constant 0 : index
    %c0_142 = arith.constant 0 : index
    %329 = vector.load %arg21[%c0_141, %c0_142] : memref<1x32xf32, #tpu.memory_space<vmem>>, vector<1x32xf32>
    %330 = vector.broadcast %329 : vector<1x32xf32> to vector<16x32xf32>
    %331 = arith.addf %328, %330 : vector<16x32xf32>
    %c0_143 = arith.constant 0 : index
    %c0_144 = arith.constant 0 : index
    %332 = vector.load %arg22[%c0_143, %c0_144] : memref<1x32xf32, #tpu.memory_space<vmem>>, vector<1x32xf32>
    %333 = vector.broadcast %332 : vector<1x32xf32> to vector<16x32xf32>
    %334 = arith.mulf %331, %333 : vector<16x32xf32>
    %335 = arith.addf %309, %334 : vector<16x32xf32>
    %c0_145 = arith.constant 0 : index
    %c0_146 = arith.constant 0 : index
    %336 = vector.load %arg23[%c0_145, %c0_146] : memref<16x16xf32, #tpu.memory_space<vmem>>, vector<16x16xf32>
    %cst_147 = arith.constant dense<0.000000e+00> : vector<16x32xf32>
    %337 = tpu.matmul %336, %335, %cst_147 {dimension_numbers = #tpu.dot_dimension_numbers<[1], [0], [0], [1], [0, 0, 1, 1], [], []>} : vector<16x16xf32>, vector<16x32xf32>, vector<16x32xf32> -> vector<16x32xf32>
    %c0_148 = arith.constant 0 : index
    %c0_149 = arith.constant 0 : index
    %338 = vector.load %arg24[%c0_148, %c0_149] : memref<16x32xf32, #tpu.memory_space<vmem>>, vector<16x32xf32>
    tpu.vector_store %arg24[%c0_148, %c0_149], %337 {strides = array<i32>} : memref<16x32xf32, #tpu.memory_space<vmem>>, vector<16x32xf32>,
    return
  }
  func.func @transform_0(%arg0: i32) -> (i32, i32) {
    %c0_i32 = arith.constant 0 : i32
    %c0_i32_0 = arith.constant 0 : i32
    return %arg0, %c0_i32 : i32, i32
  }
  func.func @transform_1(%arg0: i32) -> (i32, i32) {
    %c0_i32 = arith.constant 0 : i32
    %c0_i32_0 = arith.constant 0 : i32
    return %arg0, %c0_i32 : i32, i32
  }
  func.func @transform_2(%arg0: i32) -> (i32, i32) {
    %c0_i32 = arith.constant 0 : i32
    %c0_i32_0 = arith.constant 0 : i32
    return %arg0, %c0_i32 : i32, i32
  }
  func.func @transform_3(%arg0: i32) -> (i32, i32) {
    %c0_i32 = arith.constant 0 : i32
    %c0_i32_0 = arith.constant 0 : i32
    return %arg0, %c0_i32 : i32, i32
  }
  func.func @transform_4(%arg0: i32) -> (i32, i32) {
    %c0_i32 = arith.constant 0 : i32
    %c0_i32_0 = arith.constant 0 : i32
    %c0_i32_1 = arith.constant 0 : i32
    return %c0_i32, %c0_i32_0 : i32, i32
  }
  func.func @transform_5(%arg0: i32) -> (i32, i32) {
    %c0_i32 = arith.constant 0 : i32
    %c0_i32_0 = arith.constant 0 : i32
    %c0_i32_1 = arith.constant 0 : i32
    return %c0_i32, %c0_i32_0 : i32, i32
  }
  func.func @transform_6(%arg0: i32) -> (i32, i32) {
    %c0_i32 = arith.constant 0 : i32
    %c0_i32_0 = arith.constant 0 : i32
    %c0_i32_1 = arith.constant 0 : i32
    return %c0_i32, %c0_i32_0 : i32, i32
  }
  func.func @transform_7(%arg0: i32) -> (i32, i32) {
    %c0_i32 = arith.constant 0 : i32
    %c0_i32_0 = arith.constant 0 : i32
    %c0_i32_1 = arith.constant 0 : i32
    return %c0_i32, %c0_i32_0 : i32, i32
  }
  func.func @transform_8(%arg0: i32) -> (i32, i32) {
    %c0_i32 = arith.constant 0 : i32
    %c0_i32_0 = arith.constant 0 : i32
    %c0_i32_1 = arith.constant 0 : i32
    return %c0_i32, %c0_i32_0 : i32, i32
  }
  func.func @transform_9(%arg0: i32) -> (i32, i32) {
    %c0_i32 = arith.constant 0 : i32
    %c0_i32_0 = arith.constant 0 : i32
    %c0_i32_1 = arith.constant 0 : i32
    return %c0_i32, %c0_i32_0 : i32, i32
  }
  func.func @transform_10(%arg0: i32) -> (i32, i32) {
    %c0_i32 = arith.constant 0 : i32
    %c0_i32_0 = arith.constant 0 : i32
    %c0_i32_1 = arith.constant 0 : i32
    return %c0_i32, %c0_i32_0 : i32, i32
  }
  func.func @transform_11(%arg0: i32) -> (i32, i32) {
    %c0_i32 = arith.constant 0 : i32
    %c0_i32_0 = arith.constant 0 : i32
    %c0_i32_1 = arith.constant 0 : i32
    return %c0_i32, %c0_i32_0 : i32, i32
  }
  func.func @transform_12(%arg0: i32) -> (i32, i32) {
    %c0_i32 = arith.constant 0 : i32
    %c0_i32_0 = arith.constant 0 : i32
    %c0_i32_1 = arith.constant 0 : i32
    return %c0_i32, %c0_i32_0 : i32, i32
  }
  func.func @transform_13(%arg0: i32) -> (i32, i32) {
    %c0_i32 = arith.constant 0 : i32
    %c0_i32_0 = arith.constant 0 : i32
    %c0_i32_1 = arith.constant 0 : i32
    return %c0_i32, %c0_i32_0 : i32, i32
  }
  func.func @transform_14(%arg0: i32) -> (i32, i32) {
    %c0_i32 = arith.constant 0 : i32
    %c0_i32_0 = arith.constant 0 : i32
    %c0_i32_1 = arith.constant 0 : i32
    return %c0_i32, %c0_i32_0 : i32, i32
  }
  func.func @transform_15(%arg0: i32) -> (i32, i32) {
    %c0_i32 = arith.constant 0 : i32
    %c0_i32_0 = arith.constant 0 : i32
    %c0_i32_1 = arith.constant 0 : i32
    return %c0_i32, %c0_i32_0 : i32, i32
  }
  func.func @transform_16(%arg0: i32) -> (i32, i32) {
    %c0_i32 = arith.constant 0 : i32
    %c0_i32_0 = arith.constant 0 : i32
    %c0_i32_1 = arith.constant 0 : i32
    return %c0_i32, %c0_i32_0 : i32, i32
  }
  func.func @transform_17(%arg0: i32) -> (i32, i32) {
    %c0_i32 = arith.constant 0 : i32
    %c0_i32_0 = arith.constant 0 : i32
    %c0_i32_1 = arith.constant 0 : i32
    return %c0_i32, %c0_i32_0 : i32, i32
  }
  func.func @transform_18(%arg0: i32) -> (i32, i32) {
    %c0_i32 = arith.constant 0 : i32
    %c0_i32_0 = arith.constant 0 : i32
    %c0_i32_1 = arith.constant 0 : i32
    return %c0_i32, %c0_i32_0 : i32, i32
  }
  func.func @transform_19(%arg0: i32) -> (i32, i32) {
    %c0_i32 = arith.constant 0 : i32
    %c0_i32_0 = arith.constant 0 : i32
    %c0_i32_1 = arith.constant 0 : i32
    return %c0_i32, %c0_i32_0 : i32, i32
  }
  func.func @transform_20(%arg0: i32) -> (i32, i32) {
    %c0_i32 = arith.constant 0 : i32
    %c0_i32_0 = arith.constant 0 : i32
    %c0_i32_1 = arith.constant 0 : i32
    return %c0_i32, %c0_i32_0 : i32, i32
  }
  func.func @transform_21(%arg0: i32) -> (i32, i32) {
    %c0_i32 = arith.constant 0 : i32
    %c0_i32_0 = arith.constant 0 : i32
    %c0_i32_1 = arith.constant 0 : i32
    return %c0_i32, %c0_i32_0 : i32, i32
  }
  func.func @transform_22(%arg0: i32) -> (i32, i32) {
    %c0_i32 = arith.constant 0 : i32
    %c0_i32_0 = arith.constant 0 : i32
    %c0_i32_1 = arith.constant 0 : i32
    return %c0_i32, %c0_i32_0 : i32, i32
  }
  func.func @transform_23(%arg0: i32) -> (i32, i32) {
    %c0_i32 = arith.constant 0 : i32
    %c0_i32_0 = arith.constant 0 : i32
    return %arg0, %c0_i32 : i32, i32
  }
}

</mosaic_0001>

<bundles_post_ra>
// kernel: tile.0
= control target key start
LH: loop header
LB: loop body
LE: loop exit
PB: predicated region body
PF: predicated region fallthrough
CT: control target
= control target key end

     0   :  { %s130_s8 = smov 127   ;;  %s131_s9 = smov 123   ;;  %vm7_vm0 = vcmask 7168   ;;  %s221_s0 = inlined_call_operand.vmem [shape: f32[2,16], index: 0, kind: input, shape index: {}]   ;;  %s222_s1 = inlined_call_operand.vmem [shape: f32[32,1], index: 1, kind: output, shape index: {}]  }
   0x1   :  { %v4_v0 = vld [vmem:[%s221_s0] sm:$0x3]  ;;  %s129_s0 = smov 125   ;;  %s132_s10 = smov 124  }
   0x2   :  { %5 = vst [vmem:[#allocation0] sm:$0x3] %v4_v0  ;;  %s133_s11 = smov 126   ;;  %s134_s12 = smov 122  }
   0x3   :  { %s135_s13 = smov 120   ;;  %s136_s14 = smov 121  }
   0x4   :  { %s137_s15 = smov 119   ;;  %s138_s16 = smov 117  }
   0x5   :  { %s139_s17 = smov 118   ;;  %s140_s18 = smov 116  }
   0x6   :  { %s141_s19 = smov 114   ;;  %s142_s20 = smov 115  }
   0x7   :  { %s143_s21 = smov 113  }
   0x9   :  { %v21_v1 = vld [vmem:[#allocation0] sm:$0x3]  }
   0xa   :  { %v9_v2 = vld [vmem:[#allocation0] sm:$0x3]   ;;  %22 = vrot.lane.b32.xlu1 %v21_v1, %s129_s0 }
   0xb   :  { %10 = vrot.lane.b32.xlu0 %v9_v2, %s130_s8  ;;  %v33_v3 = vld [vmem:[#allocation0] sm:$0x3]  }
   0xc   :  { %34 = vrot.lane.b32.xlu2 %v33_v3, %s131_s9  ;;  %v27_v4 = vld [vmem:[#allocation0] sm:$0x3]  }
   0xd   :  { %v15_v5 = vld [vmem:[#allocation0] sm:$0x3]  }
   0xe   :  { %v39_v6 = vld [vmem:[#allocation0] sm:$0x3]  }
   0xf   :  { %v51_v7 = vld [vmem:[#allocation0] sm:$0x3]  }
  0x10   :  { %v45_v8 = vld [vmem:[#allocation0] sm:$0x3]  }
  0x11   :  { %v57_v9 = vld [vmem:[#allocation0] sm:$0x3]  }
  0x12   :  { %28 = vrot.lane.b32.xlu1 %v27_v4, %s132_s10  ;;  %v69_v10 = vld [vmem:[#allocation0] sm:$0x3]  }
  0x13   :  { %16 = vrot.lane.b32.xlu0 %v15_v5, %s133_s11  ;;  %v63_v11 = vld [vmem:[#allocation0] sm:$0x3]  }
  0x14   :  { %40 = vrot.lane.b32.xlu2 %v39_v6, %s134_s12  ;;  %v75_v12 = vld [vmem:[#allocation0] sm:$0x3]  }
  0x15   :  { %v87_v13 = vld [vmem:[#allocation0] sm:$0x3]  }
  0x16   :  { %v81_v14 = vld [vmem:[#allocation0] sm:$0x3]  }
  0x17   :  { %v93_v15 = vld [vmem:[#allocation0] sm:$0x3]  }
  0x18   :  { %v6_v21 = vld [vmem:[#allocation0] sm:$0x3]  }
  0x19   :  { %8 = vst.msk [vmem:[%s222_s1] ss:$16 sm:$0x3] %vm7_vm0, %v6_v21  }
  0x1a   :  { %52 = vrot.lane.b32.xlu1 %v51_v7, %s135_s13 }
  0x1b   :  { %46 = vrot.lane.b32.xlu0 %v45_v8, %s136_s14 }
  0x1c   :  { %58 = vrot.lane.b32.xlu2 %v57_v9, %s137_s15 }
  0x22   :  { %70 = vrot.lane.b32.xlu1 %v69_v10, %s138_s16 }
  0x23   :  { %64 = vrot.lane.b32.xlu0 %v63_v11, %s139_s17 }
  0x24   :  { %76 = vrot.lane.b32.xlu2 %v75_v12, %s140_s18 }
  0x2a   :  { %88 = vrot.lane.b32.xlu1 %v87_v13, %s141_s19 }
  0x2b   :  { %82 = vrot.lane.b32.xlu0 %v81_v14, %s142_s20 }
  0x2c   :  { %94 = vrot.lane.b32.xlu2 %v93_v15, %s143_s21 }
  0x66   :  { %v35_v16 = vpop.permute.xlu2 %34  }
  0x67   :  { %103 = vst.msk [vmem:[%s222_s1 + $0x5] ss:$16 sm:$0x3] %vm7_vm0, %v35_v16  }
  0x6e   :  { %v41_v17 = vpop.permute.xlu2 %40  }
  0x6f   :  { %104 = vst.msk [vmem:[%s222_s1 + $0x6] ss:$16 sm:$0x3] %vm7_vm0, %v41_v17  }
  0x76   :  { %v59_v18 = vpop.permute.xlu2 %58  }
  0x77   :  { %107 = vst.msk [vmem:[%s222_s1 + $0x9] ss:$16 sm:$0x3] %vm7_vm0, %v59_v18  }
  0x7c   :  { %v23_v19 = vpop.permute.xlu1 %22  }
  0x7d   :  { %v11_v20 = vpop.permute.xlu0 %10   ;;  %101 = vst.msk [vmem:[%s222_s1 + $0x3] ss:$16 sm:$0x3] %vm7_vm0, %v23_v19  }
  0x7e   :  { %99 = vst.msk [vmem:[%s222_s1 + $0x1] ss:$16 sm:$0x3] %vm7_vm0, %v11_v20   ;;  %v77_v22 = vpop.permute.xlu2 %76  }
  0x7f   :  { %110 = vst.msk [vmem:[%s222_s1 + $0xc] ss:$16 sm:$0x3] %vm7_vm0, %v77_v22  }
  0x84   :  { %v29_v23 = vpop.permute.xlu1 %28  }
  0x85   :  { %v17_v24 = vpop.permute.xlu0 %16   ;;  %102 = vst.msk [vmem:[%s222_s1 + $0x4] ss:$16 sm:$0x3] %vm7_vm0, %v29_v23  }
  0x86   :  { %100 = vst.msk [vmem:[%s222_s1 + $0x2] ss:$16 sm:$0x3] %vm7_vm0, %v17_v24   ;;  %v95_v25 = vpop.permute.xlu2 %94  }
  0x87   :  { %113 = vst.msk [vmem:[%s222_s1 + $0xf] ss:$16 sm:$0x3] %vm7_vm0, %v95_v25  }
  0x8c   :  { %v53_v26 = vpop.permute.xlu1 %52  }
  0x8d   :  { %v47_v27 = vpop.permute.xlu0 %46   ;;  %106 = vst.msk [vmem:[%s222_s1 + $0x8] ss:$16 sm:$0x3] %vm7_vm0, %v53_v26  }
  0x8e   :  { %105 = vst.msk [vmem:[%s222_s1 + $0x7] ss:$16 sm:$0x3] %vm7_vm0, %v47_v27  }
  0x94   :  { %v71_v28 = vpop.permute.xlu1 %70  }
  0x95   :  { %v65_v29 = vpop.permute.xlu0 %64   ;;  %109 = vst.msk [vmem:[%s222_s1 + $0xb] ss:$16 sm:$0x3] %vm7_vm0, %v71_v28  }
  0x96   :  { %108 = vst.msk [vmem:[%s222_s1 + $0xa] ss:$16 sm:$0x3] %vm7_vm0, %v65_v29  }
  0x9c   :  { %v89_v30 = vpop.permute.xlu1 %88  }
  0x9d   :  { %v83_v31 = vpop.permute.xlu0 %82   ;;  %112 = vst.msk [vmem:[%s222_s1 + $0xe] ss:$16 sm:$0x3] %vm7_vm0, %v89_v30  }
  0x9e   :  { %111 = vst.msk [vmem:[%s222_s1 + $0xd] ss:$16 sm:$0x3] %vm7_vm0, %v83_v31  }

// kernel: deco_decoder_layer_forward.1
= control target key start
LH: loop header
LB: loop body
LE: loop exit
PB: predicated region body
PF: predicated region fallthrough
CT: control target
= control target key end

     0   :  { %s2486_s0 = inlined_call_operand.vmem [shape: f32[32,32], index: 0, kind: input, shape index: {}]   ;;  %s2487_s1 = inlined_call_operand.vmem [shape: f32[32,32], index: 1, kind: input, shape index: {}]   ;;  %s2488_s2 = inlined_call_operand.vmem [shape: f32[32,1], index: 2, kind: input, shape index: {}]   ;;  %s2489_s3 = inlined_call_operand.vmem [shape: f32[32,1], index: 3, kind: input, shape index: {}]   ;;  %s2490_s4 = inlined_call_operand.vmem [shape: f32[9,32], index: 4, kind: input, shape index: {}]   ;;  %s2491_s5 = inlined_call_operand.vmem [shape: f32[1,32], index: 5, kind: input, shape index: {}]   ;;  %s2492_s6 = inlined_call_operand.vmem [shape: f32[1,32], index: 6, kind: input, shape index: {}]   ;;  %s2493_s7 = inlined_call_operand.vmem [shape: f32[1,32], index: 7, kind: input, shape index: {}]   ;;  %s2494_s8 = inlined_call_operand.vmem [shape: f32[32,128], index: 8, kind: input, shape index: {}]   ;;  %s2495_s9 = inlined_call_operand.vmem [shape: f32[1,128], index: 9, kind: input, shape index: {}]   ;;  %s2496_s10 = inlined_call_operand.vmem [shape: f32[128,32], index: 10, kind: input, shape index: {}]   ;;  %s2497_s11 = inlined_call_operand.vmem [shape: f32[1,32], index: 11, kind: input, shape index: {}]   ;;  %s2498_s12 = inlined_call_operand.vmem [shape: f32[1,32], index: 12, kind: input, shape index: {}]   ;;  %s2499_s13 = inlined_call_operand.vmem [shape: f32[9,32], index: 13, kind: input, shape index: {}]   ;;  %s2500_s14 = inlined_call_operand.vmem [shape: f32[1,32], index: 14, kind: input, shape index: {}]   ;;  %s2501_s15 = inlined_call_operand.vmem [shape: f32[1,32], index: 15, kind: input, shape index: {}]   ;;  %s2502_s16 = inlined_call_operand.vmem [shape: f32[1,32], index: 16, kind: input, shape index: {}]   ;;  %s2503_s17 = inlined_call_operand.vmem [shape: f32[32,128], index: 17, kind: input, shape index: {}]   ;;  %s2504_s18 = inlined_call_operand.vmem [shape: f32[1,128], index: 18, kind: input, shape index: {}]   ;;  %s2505_s19 = inlined_call_operand.vmem [shape: f32[128,32], index: 19, kind: input, shape index: {}]   ;;  %s2506_s20 = inlined_call_operand.vmem [shape: f32[1,32], index: 20, kind: input, shape index: {}]   ;;  %s2507_s21 = inlined_call_operand.vmem [shape: f32[1,32], index: 21, kind: input, shape index: {}]   ;;  %s2508_s22 = inlined_call_operand.vmem [shape: f32[16,16], index: 22, kind: input, shape index: {}]   ;;  %s2509_s23 = inlined_call_operand.vmem [shape: f32[32,32], index: 23, kind: output, shape index: {}]  }
   0x1   :  { %2511 = sst [smem:[#allocation2_spill]] %s2486_s0 }
   0x2   :  { %2512 = sst [smem:[#allocation3_spill]] %s2487_s1 }
   0x3   :  { %2513 = sst [smem:[#allocation4_spill]] %s2488_s2 }
   0x4   :  { %2514 = sst [smem:[#allocation5_spill]] %s2489_s3 }
   0x5   :  { %2515 = sst [smem:[#allocation6_spill]] %s2490_s4  ;;  %s1948_s4 = smov 0  }
   0x6   :  { %2516 = sst [smem:[#allocation7_spill]] %s2491_s5 }
   0x7   :  { %2517 = sst [smem:[#allocation8_spill]] %s2492_s6 }
   0x8   :  { %2518 = sst [smem:[#allocation9_spill]] %s2493_s7 }
   0x9 LB: > { %s1732_s30 = sadd.s32 4294967295, %s1824_s4   ;;  %p1736_p0 = scmp.ge.s32.totalorder %s1824_s4, 1  ;;  %s1824_s4 = sphi %s1948_s4, %s33_s4  }
   0xa   : > { %p671_p1 = scmp.lt.s32.totalorder %s1824_s4, 3 }
   0xc   : > { %p672_p2 = pnand %p1736_p0, %p671_p1 }
   0xd   : > { %s1737_s24 = sshll.u32 (!%p672_p2), %s1732_s30, 1  ;;  %s2519_s26 = sld [smem:[#allocation5_spill]] (!%p672_p2) }
   0xe   : > { %675 = sbr.rel (%p672_p2) target bundleno = 1575 (0x627), region = 112  ;;  %p751_p3 = scmp.lt.s32.totalorder (!%p672_p2), %s1737_s24, 3 }
   0xf   : > { %s2520_s7 = sld [smem:[#allocation4_spill]] (!%p672_p2) }
  0x10   : > { %s2521_s0 = sld [smem:[#allocation2_spill]] (!%p672_p2) }
  0x11   : > { %s2522_s1 = sld [smem:[#allocation6_spill]] (!%p672_p2) }
  0x12   : > { %s2523_s29 = sld [smem:[#allocation7_spill]] (!%p672_p2) }
  0x13   : > { %v1826_v0 = vmov 0   ;;  %s2528_s24 = smov (!%p751_p3, %s1737_s24), 3  ;;  %v796_v53 = vlaneseq  ;;  %vm1041_vm7 = vcmask 261120  }
  0x14   : > { %1769 = vset.pattern.permute.xlu2 %v1826_v0  ;;  %1768 = vset.pattern.permute.xlu1 %v1826_v0  ;;  %s1956_s25 = sshll.u32 %s2528_s24, 3 }
  0x15   : > { %1767 = vset.pattern.permute.xlu0 %v1826_v0  ;;  %s772_s2 = scalar_lea.vmem %s2519_s26, %s1956_s25  ;;  %s766_s28 = scalar_lea.vmem %s2520_s7, %s1956_s25  ;;  %v1976_v57 = vshrl.u32 %v796_v53, 7 }
  0x16   : > { %v783_v1 = vld [vmem:[%s772_s2] sm:$0xff]  ;;  %v784_v2 = vld [vmem:[%s772_s2 + $0x8] sm:$0xff]  ;;  %s754_s30 = scalar_lea.vmem %s2521_s0, %s1956_s25  ;;  %s2525_s0 = sld [smem:[#allocation9_spill]] }
  0x17   : > { %v863_v3 = vadd.f32 -1.0, %v783_v1  ;;  %v834_v4 = vadd.f32 -2.0, %v783_v1  ;;  %v805_v5 = vadd.f32 -3.0, %v783_v1  ;;  %v864_v6 = vadd.f32 -1.0, %v784_v2  ;;  %v782_v49 = vld [vmem:[%s766_s28 + $0x8] sm:$0xff]  ;;  %v781_v50 = vld [vmem:[%s766_s28] sm:$0xff]  ;;  %s778_s3 = scalar_lea.vmem %s2509_s23, %s1956_s25 }
  0x18   : > { %v835_v10 = vadd.f32 -2.0, %v784_v2  ;;  %v806_v11 = vadd.f32 -3.0, %v784_v2  ;;  %v927_v20 = vsub.f32 15.0, %v783_v1  ;;  %v895_v23 = vmax.f32 %v784_v2, 0.0  ;;  %v785_v51 = vld [vmem:[%s754_s30] sm:$0xff]  ;;  %v786_v52 = vld [vmem:[%s754_s30 + $0x8] sm:$0xff] }
  0x19   : > { %v865_v7 = vmax.f32 %v863_v3, 0.0  ;;  %v836_v8 = vmax.f32 %v834_v4, 0.0  ;;  %v807_v9 = vmax.f32 %v805_v5, 0.0  ;;  %v866_v15 = vmax.f32 %v864_v6, 0.0  ;;  %v1775_v62 = vld [vmem:[%s2522_s1] ss:$0 sm:$0xff] }
  0x1a   : > { %v837_v16 = vmax.f32 %v835_v10, 0.0  ;;  %v808_v17 = vmax.f32 %v806_v11, 0.0  ;;  %v929_v22 = vmax.f32 %v927_v20, 0.0  ;;  %v894_v24 = vmax.f32 %v783_v1, 0.0  ;;  %v1773_v6 = vld [vmem:[%s2522_s1 + $0x1] ss:$0 sm:$0xff] }
  0x1b   : > { %v867_v12 = vmin.f32 %v865_v7, 1.0  ;;  %v838_v13 = vmin.f32 %v836_v8, 1.0  ;;  %v809_v14 = vmin.f32 %v807_v9, 1.0  ;;  %v868_v18 = vmin.f32 %v866_v15, 1.0  ;;  %s2524_s28 = sld [smem:[#allocation8_spill]] }
  0x1c   : > { %v839_v19 = vmin.f32 %v837_v16, 1.0  ;;  %v810_v21 = vmin.f32 %v808_v17, 1.0  ;;  %v931_v25 = vmin.f32 %v929_v22, 1.0  ;;  %v897_v26 = vmin.f32 %v895_v23, 1.0  ;;  %s2526_s2 = sld [smem:[#allocation3_spill]] }
  0x1d   : > { %871 = vperm.xlu2 %1769, %v867_v12   ;;  %842 = vperm.xlu1 %1768, %v838_v13   ;;  %v957_v27 = vsub.f32 14.0, %v784_v2  ;;  %v956_v28 = vsub.f32 14.0, %v783_v1  ;;  %v896_v29 = vmin.f32 %v894_v24, 1.0  ;;  %v928_v30 = vsub.f32 15.0, %v784_v2  ;;  %v1770_v13 = vld [vmem:[%s2522_s1 + $0x2] ss:$0 sm:$0xff] }
  0x1e   : > { %813 = vperm.xlu0 %1767, %v809_v14   ;;  %v1009_v36 = vsub.f32 12.0, %v783_v1  ;;  %v986_v37 = vsub.f32 13.0, %v784_v2  ;;  %v985_v39 = vsub.f32 13.0, %v783_v1  ;;  %v1010_v46 = vsub.f32 12.0, %v784_v2  ;;  %v1774_v14 = vld [vmem:[%s2523_s29] ss:$0 sm:$0xff] }
  0x1f   : > { %v959_v31 = vmax.f32 %v957_v27, 0.0  ;;  %v958_v32 = vmax.f32 %v956_v28, 0.0  ;;  %v930_v33 = vmax.f32 %v928_v30, 0.0  ;;  %v1972_v55 = vmul.f32 2.0, %v785_v51  ;;  %v1772_v51 = vld [vmem:[%s2522_s1 + $0x6] ss:$0 sm:$0xff] }
  0x20   : > { %v1011_v40 = vmax.f32 %v1009_v36, 0.0  ;;  %v988_v41 = vmax.f32 %v986_v37, 0.0  ;;  %v987_v42 = vmax.f32 %v985_v39, 0.0  ;;  %v1012_v47 = vmax.f32 %v1010_v46, 0.0 }
  0x21   : > { %v961_v34 = vmin.f32 %v959_v31, 1.0  ;;  %v960_v35 = vmin.f32 %v958_v32, 1.0  ;;  %v932_v38 = vmin.f32 %v930_v33, 1.0  ;;  %v1974_v56 = vmul.f32 2.0, %v786_v52 }
  0x22   : > { %v1013_v43 = vmin.f32 %v1011_v40, 1.0  ;;  %v990_v44 = vmin.f32 %v988_v41, 1.0  ;;  %v989_v45 = vmin.f32 %v987_v42, 1.0  ;;  %v1014_v48 = vmin.f32 %v1012_v47, 1.0  ;;  %s760_s6 = scalar_lea.vmem %s2526_s2, %s1956_s25 }
  0x23   : > { %v794_v58 = vrot.slane %v1972_v55, 4  ;;  %v795_v59 = vrot.slane %v1974_v56, 4  ;;  %vm798_vm0 = vcmp.lt.s32.totalorder %v1976_v57, 4  ;;  %v825_v1 = vrot.slane %v1972_v55, 5 }
  0x24   : > { %v826_v2 = vrot.slane %v1974_v56, 5  ;;  %vm827_vm1 = vcmp.lt.s32.totalorder %v1976_v57, 3  ;;  %v854_v4 = vrot.slane %v1972_v55, 6  ;;  %v855_v5 = vrot.slane %v1974_v56, 6 }
  0x25   : > { %876 = vperm.xlu2 %1769, %v868_v18   ;;  %847 = vperm.xlu1 %1768, %v839_v19   ;;  %v1990_v63 = vsel %vm798_vm0, %v795_v59, %v794_v58  ;;  %vm856_vm2 = vcmp.lt.s32.totalorder %v1976_v57, 2  ;;  %v2010_v9 = vsel %vm798_vm0, %v794_v58, %v795_v59  ;;  %v883_v11 = vrot.slane %v1972_v55, 7  ;;  %v1777_v19 = vld [vmem:[%s2522_s1 + $0x3] ss:$0 sm:$0xff] }
  0x26   : > { %818 = vperm.xlu0 %1767, %v810_v21   ;;  %v803_v3 = vmul.f32 %v1775_v62, %v1990_v63  ;;  %v829_v8 = vsel %vm827_vm1, %v826_v2, %v825_v1  ;;  %v884_v12 = vrot.slane %v1974_v56, 7  ;;  %vm885_vm3 = vcmp.lt.s32.totalorder %v1976_v57, 1 }
  0x27   : > { %v858_v16 = vsel %vm856_vm2, %v855_v5, %v854_v4  ;;  %v832_v17 = vmul.f32 %v1773_v6, %v829_v8  ;;  %v804_v18 = vmul.f32 %v1775_v62, %v2010_v9  ;;  %v828_v24 = vsel %vm827_vm1, %v825_v1, %v826_v2  ;;  %v1779_v8 = vld [vmem:[%s2522_s1 + $0x7] ss:$0 sm:$0xff] }
  0x28   : > { %v887_v20 = vsel %vm885_vm3, %v884_v12, %v883_v11  ;;  %v861_v21 = vmul.f32 %v1770_v13, %v858_v16  ;;  %v857_v31 = vsel %vm856_vm2, %v854_v4, %v855_v5  ;;  %v833_v33 = vmul.f32 %v1773_v6, %v828_v24  ;;  %v1776_v16 = vld [vmem:[%s2522_s1 + $0x8] ss:$0 sm:$0xff] }
  0x29   : > { %v890_v28 = vmul.f32 %v1777_v19, %v887_v20  ;;  %v886_v36 = vsel %vm885_vm3, %v883_v11, %v884_v12  ;;  %vm920_vm4 = vcmp.lt.s32.totalorder %v1976_v57, 7  ;;  %v862_v40 = vmul.f32 %v1770_v13, %v857_v31 }
  0x2a   : > { %v947_v41 = vrot.slane %v1972_v55, 2  ;;  %v948_v42 = vrot.slane %v1974_v56, 2  ;;  %vm949_vm5 = vcmp.lt.s32.totalorder %v1976_v57, 6  ;;  %vm978_vm6 = vcmp.lt.s32.totalorder %v1976_v57, 5 }
  0x2d   : > { %935 = vperm.xlu2 %1769, %v931_v25   ;;  %905 = vperm.xlu1 %1768, %v897_v26  }
  0x2e   : > { %900 = vperm.xlu0 %1767, %v896_v29  }
  0x35   : > { %969 = vperm.xlu2 %1769, %v961_v34   ;;  %964 = vperm.xlu1 %1768, %v960_v35   ;;  %v918_v34 = vrot.slane %v1972_v55, 1  ;;  %v919_v35 = vrot.slane %v1974_v56, 1 }
  0x36   : > { %940 = vperm.xlu0 %1767, %v932_v38   ;;  %v1778_v38 = vld [vmem:[%s2522_s1 + $0x4] ss:$0 sm:$0xff] }
  0x37   : > { %v921_v47 = vsel %vm920_vm4, %v918_v34, %v919_v35  ;;  %v914_v59 = vmul.f32 %v1778_v38, %v1972_v55  ;;  %v922_v2 = vsel %vm920_vm4, %v919_v35, %v918_v34 }
  0x3d   : > { %1017 = vperm.xlu2 %1769, %v1013_v43   ;;  %998 = vperm.xlu1 %1768, %v990_v44   ;;  %v1771_v43 = vld [vmem:[%s2522_s1 + $0x5] ss:$0 sm:$0xff] }
  0x3e   : > { %993 = vperm.xlu0 %1767, %v989_v45   ;;  %v891_v45 = vmul.f32 %v1777_v19, %v886_v36  ;;  %v925_v4 = vmul.f32 %v1771_v43, %v921_v47 }
  0x45   : > { %1036 = vperm.xlu2 %1769, %v782_v49   ;;  %1031 = vperm.xlu1 %1768, %v781_v50   ;;  %v976_v49 = vrot.slane %v1972_v55, 3  ;;  %v977_v50 = vrot.slane %v1974_v56, 3 }
  0x46   : > { %1022 = vperm.xlu0 %1767, %v1014_v48   ;;  %v950_v48 = vsel %vm949_vm5, %v947_v41, %v948_v42 }
  0x47   : > { %v954_v6 = vmul.f32 %v1772_v51, %v950_v48  ;;  %v979_v11 = vsel %vm978_vm6, %v976_v49, %v977_v50 }
  0x77   : > { %v1970_v54 = vpop.permute.xlu2 %871 }
  0x78   : > { %v879_v30 = vmul.f32 %v1970_v54, %v861_v21  ;;  %v983_v21 = vmul.f32 %v1779_v8, %v979_v11 }
  0x7f   : > { %v1992_v0 = vpop.permute.xlu2 %876 }
  0x87   : > { %v2032_v22 = vpop.permute.xlu2 %935 }
  0x8f   : > { %v1980_v60 = vpop.permute.xlu1 %842  ;;  %v2070_v52 = vpop.permute.xlu2 %969 }
  0x90   : > { %v1983_v61 = vpop.permute.xlu0 %813  ;;  %v850_v25 = vmul.f32 %v1980_v60, %v832_v17  ;;  %v915_v17 = vmul.f32 %v1778_v38, %v1974_v56 }
  0x91   : > { %v821_v15 = vmul.f32 %v1983_v61, %v803_v3  ;;  %v880_v3 = vmul.f32 %v1992_v0, %v862_v40 }
  0x93   : > { %v823_v23 = vadd.f32 %v1774_v14, %v821_v15  ;;  %v951_v15 = vsel %vm949_vm5, %v948_v42, %v947_v41  ;;  %v1008_v42 = vmul.f32 %v1776_v16, %v1990_v63 }
  0x95   : > { %v852_v32 = vadd.f32 %v850_v25, %v823_v23  ;;  %v980_v23 = vsel %vm978_vm6, %v977_v50, %v976_v49 }
  0x96   : > { %v984_v35 = vmul.f32 %v1779_v8, %v980_v23 }
  0x97   : > { %v2004_v7 = vpop.permute.xlu1 %847  ;;  %v881_v46 = vadd.f32 %v879_v30, %v852_v32  ;;  %v1007_v30 = vmul.f32 %v1776_v16, %v2010_v9  ;;  %v2103_v32 = vpop.permute.xlu2 %1017 }
  0x98   : > { %v2012_v10 = vpop.permute.xlu0 %818  ;;  %v851_v44 = vmul.f32 %v2004_v7, %v833_v33 }
  0x99   : > { %v822_v26 = vmul.f32 %v2012_v10, %v804_v18  ;;  %v943_v18 = vmul.f32 %v2032_v22, %v925_v4 }
  0x9b   : > { %v824_v37 = vadd.f32 %v1774_v14, %v822_v26  ;;  %v926_v14 = vmul.f32 %v1771_v43, %v922_v2 }
  0x9d   : > { %v853_v53 = vadd.f32 %v851_v44, %v824_v37 }
  0x9f   : > { %v2038_v27 = vpop.permute.xlu1 %905  ;;  %v882_v12 = vadd.f32 %v880_v3, %v853_v53 }
  0xa0   : > { %v2040_v29 = vpop.permute.xlu0 %900  ;;  %v909_v5 = vmul.f32 %v2038_v27, %v891_v45 }
  0xa1   : > { %v908_v39 = vmul.f32 %v2040_v29, %v890_v28  ;;  %v955_v28 = vmul.f32 %v1772_v51, %v951_v15  ;;  %v2117_v51 = vpop.permute.xlu2 %1036 }
  0xa2   : > { %v911_v19 = vadd.f32 %v909_v5, %v882_v12 }
  0xa3   : > { %v910_v58 = vadd.f32 %v908_v39, %v881_v46  ;;  %v1025_v39 = vmul.f32 %v2103_v32, %v1007_v30  ;;  %v973_v40 = vmul.f32 %v2070_v52, %v955_v28 }
  0xa4   : > { %v917_v34 = vadd.f32 %v915_v17, %v911_v19 }
  0xa5   : > { %v916_v13 = vadd.f32 %v914_v59, %v910_v58  ;;  %v1827_v58 = vmov 32.0  }
  0xa6   : > { %1800 = vrcp.f32 %v1827_v58 }
  0xa7   : > { %v2073_v62 = vpop.permute.xlu1 %964  ;;  %v945_v24 = vadd.f32 %v943_v18, %v916_v13 }
  0xa8   : > { %v2076_v1 = vpop.permute.xlu0 %940  ;;  %v972_v20 = vmul.f32 %v2073_v62, %v954_v6 }
  0xa9   : > { %v944_v25 = vmul.f32 %v2076_v1, %v926_v14 }
  0xaa   : > { %v974_v33 = vadd.f32 %v972_v20, %v945_v24  ;;  %v1108_v20 = vld [vmem:[%s2494_s8 + $0x10] sm:$0xff]  ;;  %v1106_v24 = vld [vmem:[%s2494_s8] sm:$0xff] }
  0xab   : > { %v946_v37 = vadd.f32 %v944_v25, %v917_v34  ;;  %v1107_v25 = vld [vmem:[%s2494_s8 + $0x8] sm:$0xff] }
  0xac   : > { %v1801_v59 = vpop.eup %1800 }
  0xad   : > { %v975_v43 = vadd.f32 %v973_v40, %v946_v37  ;;  %v1049_v2 = vmul.f32 32.0, %v1801_v59  ;;  %vm1053_vm8 = vweird.f32 %v1801_v59 }
  0xaf   : > { %v2098_v26 = vpop.permute.xlu1 %998  ;;  %v1050_v3 = vsub.f32 1.0, %v1049_v2 }
  0xb0   : > { %v2101_v31 = vpop.permute.xlu0 %993  ;;  %v1002_v41 = vmul.f32 %v2098_v26, %v984_v35 }
  0xb1   : > { %v1001_v36 = vmul.f32 %v2101_v31, %v983_v21  ;;  %v1051_v4 = vmul.f32 %v1801_v59, %v1050_v3  ;;  %v1109_v21 = vld [vmem:[%s2494_s8 + $0x18] sm:$0xff] }
  0xb2   : > { %v1004_v47 = vadd.f32 %v1002_v41, %v975_v43  ;;  %v1111_v23 = vpack.c.bf16 %v1109_v21, %v1108_v20  ;;  %v1234_v20 = vld [vmem:[%s2496_s10 + $0x60] sm:$0xff]  ;;  %v1235_v21 = vld [vmem:[%s2496_s10 + $0x68] sm:$0xff] }
  0xb3   : > { %v1003_v38 = vadd.f32 %v1001_v36, %v974_v33  ;;  %v1052_v5 = vadd.f32 %v1801_v59, %v1051_v4  ;;  %v1110_v33 = vpack.c.bf16 %v1107_v25, %v1106_v24  ;;  %v1781_v4 = vld [vmem:[%s2525_s0] ss:$0 sm:$0xff]  ;;  %v1232_v25 = vld [vmem:[%s2496_s10 + $0x50] sm:$0xff] }
  0xb4   : > { %1125 = vmatpush.bf16.msra.mxu0 %v1111_v23  ;;  %v1244_v23 = vpack.c.bf16 %v1235_v21, %v1234_v20 }
  0xb5   : > { %v1027_v9 = vadd.f32 %v1025_v39, %v1003_v38  ;;  %v2121_v6 = vsel %vm1053_vm8, %v1801_v59, %v1052_v5 }
  0xb7   : > { %v2110_v44 = vpop.permute.xlu1 %1031 }
  0xb8   : > { %v2112_v45 = vpop.permute.xlu0 %1022  ;;  %v1039_v46 = vmul.f32 %v2110_v44, %v1027_v9  ;;  %1126 = vmatpush.bf16.msra.mxu0 %v1110_v33 }
  0xb9   : > { %v1026_v48 = vmul.f32 %v2112_v45, %v1008_v42 }
  0xba   : > { %v1042_v49 = vsel %vm1041_vm7, %v1039_v46, 0.0 }
  0xbb   : > { %v1028_v50 = vadd.f32 %v1026_v48, %v1004_v47  ;;  %1043 = vadd.xlane.f32.xlu0 %v1042_v49 }
  0xbd   : > { %v1040_v63 = vmul.f32 %v2117_v51, %v1028_v50 }
  0xbf   : > { %v1045_v53 = vsel %vm1041_vm7, %v1040_v63, 0.0 }
  0xc0   : > { %1046 = vadd.xlane.f32.xlu1 %v1045_v53  ;;  %v1780_v53 = vld [vmem:[%s2524_s28] ss:$0 sm:$0xff] }
 0x12e   : > { %v1044_v8 = vpop.xlane.xlu0 %1043 }
 0x12f   : > { %v1055_v11 = vmul.f32 %v2121_v6, %v1044_v8 }
 0x131   : > { %v1057_v12 = vsub.f32 %v1039_v46, %v1055_v11 }
 0x133   : > { %v1047_v13 = vpop.xlane.xlu1 %1046  ;;  %v1059_v14 = vmul.f32 %v1057_v12, %v1057_v12 }
 0x134   : > { %v1056_v15 = vmul.f32 %v2121_v6, %v1047_v13 }
 0x135   : > { %v1061_v16 = vsel %vm1041_vm7, %v1059_v14, 0.0  ;;  %v1236_v14 = vld [vmem:[%s2496_s10 + $0x70] sm:$0xff] }
 0x136   : > { %v1058_v17 = vsub.f32 %v1040_v63, %v1056_v15  ;;  %1062 = vadd.xlane.f32.xlu2 %v1061_v16  ;;  %v1237_v15 = vld [vmem:[%s2496_s10 + $0x78] sm:$0xff] }
 0x138   : > { %v1060_v18 = vmul.f32 %v1058_v17, %v1058_v17 }
 0x13a   : > { %v1064_v19 = vsel %vm1041_vm7, %v1060_v18, 0.0 }
 0x13e   : > { %1065 = vadd.xlane.f32.xlu2 %v1064_v19 }
 0x1a9   : > { %v1063_v28 = vpop.xlane.xlu2 %1062 }
 0x1aa   : > { %v1067_v30 = vmul.f32 %v1063_v28, %v2121_v6  ;;  %v1233_v28 = vld [vmem:[%s2496_s10 + $0x58] sm:$0xff] }
 0x1ac   : > { %v1069_v34 = vadd.f32 1e-06, %v1067_v30  ;;  %v1243_v30 = vpack.c.bf16 %v1233_v28, %v1232_v25  ;;  %v1222_v25 = vld [vmem:[%s2496_s10] sm:$0xff]  ;;  %v1223_v28 = vld [vmem:[%s2496_s10 + $0x8] sm:$0xff] }
 0x1ae   : > { %1802 = vrsqrt.f32 %v1069_v34  ;;  %vm1077_vm10 = vweird.f32 %v1069_v34 }
 0x1b1   : > { %v1066_v35 = vpop.xlane.xlu2 %1065 }
 0x1b2   : > { %v1068_v36 = vmul.f32 %v1066_v35, %v2121_v6  ;;  %v1231_v35 = vld [vmem:[%s2496_s10 + $0x48] sm:$0xff] }
 0x1b4   : > { %v1803_v37 = vpop.eup %1802  ;;  %v1070_v38 = vadd.f32 1e-06, %v1068_v36 }
 0x1b5   : > { %v1072_v39 = vmul.f32 %v1803_v37, %v1069_v34  ;;  %vm1078_vm9 = vweird.f32 %v1803_v37  ;;  %v1230_v34 = vld [vmem:[%s2496_s10 + $0x40] sm:$0xff] }
 0x1b6   : > { %1804 = vrsqrt.f32 %v1070_v38  ;;  %vm1079_vm11 = vmor %vm1077_vm10, %vm1078_vm9  ;;  %vm1087_vm13 = vweird.f32 %v1070_v38 }
 0x1b7   : > { %v1073_v40 = vmul.f32 %v1803_v37, %v1072_v39  ;;  %v1242_v39 = vpack.c.bf16 %v1231_v35, %v1230_v34 }
 0x1b9   : > { %v1074_v41 = vmul.f32 0.5, %v1073_v40 }
 0x1bb   : > { %v1075_v42 = vsub.f32 1.5, %v1074_v41 }
 0x1bc   : > { %v1805_v9 = vpop.eup %1804 }
 0x1bd   : > { %v1076_v43 = vmul.f32 %v1803_v37, %v1075_v42  ;;  %v1082_v46 = vmul.f32 %v1805_v9, %v1070_v38  ;;  %vm1088_vm12 = vweird.f32 %v1805_v9 }
 0x1be   : > { %vm1089_vm14 = vmor %vm1087_vm13, %vm1088_vm12 }
 0x1bf   : > { %v1083_v47 = vmul.f32 %v1805_v9, %v1082_v46  ;;  %v1080_v48 = vsel %vm1079_vm11, %v1803_v37, %v1076_v43  ;;  %v1229_v43 = vld [vmem:[%s2496_s10 + $0x38] sm:$0xff] }
 0x1c0   : > { %v1091_v63 = vmul.f32 %v1080_v48, %v1057_v12  ;;  %v1782_v12 = vld [vmem:[%s2495_s9] ss:$0 sm:$0xff] }
 0x1c1   : > { %v1084_v49 = vmul.f32 0.5, %v1083_v47 }
 0x1c2   : > { %v1097_v3 = vmul.f32 %v1780_v53, %v1091_v63 }
 0x1c3   : > { %v1085_v50 = vsub.f32 1.5, %v1084_v49 }
 0x1c4   : > { %v1103_v8 = vadd.f32 %v1781_v4, %v1097_v3 }
 0x1c5   : > { %v1086_v58 = vmul.f32 %v1805_v9, %v1085_v50 }
 0x1c7   : > { %v1090_v59 = vsel %vm1089_vm14, %v1805_v9, %v1086_v58  ;;  %v1228_v9 = vld [vmem:[%s2496_s10 + $0x30] sm:$0xff]  ;;  %v1227_v58 = vld [vmem:[%s2496_s10 + $0x28] sm:$0xff] }
 0x1c8   : > { %v1092_v2 = vmul.f32 %v1090_v59, %v1058_v17  ;;  %v1245_v17 = vpack.c.bf16 %v1237_v15, %v1236_v14  ;;  %v1241_v49 = vpack.c.bf16 %v1229_v43, %v1228_v9 }
 0x1ca   : > { %v1098_v5 = vmul.f32 %v1780_v53, %v1092_v2  ;;  %1250 = vmatpush.bf16.msra.mxu1 %v1245_v17  ;;  %v1226_v53 = vld [vmem:[%s2496_s10 + $0x20] sm:$0xff] }
 0x1cc   : > { %v1104_v11 = vadd.f32 %v1781_v4, %v1098_v5  ;;  %v1240_v5 = vpack.c.bf16 %v1227_v58, %v1226_v53 }
 0x1ce   : > { %v1105_v13 = vpack.c.bf16 %v1104_v11, %v1103_v8  ;;  %1251 = vmatpush.bf16.msra.mxu1 %v1244_v23 }
 0x1d0   : > { %1747 = vmatmul.msk.bf16.vlgmr.msra.gmra.mxu0 %vm1041_vm7, %v1105_v13  ;;  %v1224_v13 = vld [vmem:[%s2496_s10 + $0x10] sm:$0xff] }
 0x1d2   : > { %1252 = vmatpush.bf16.msra.mxu1 %v1243_v30 }
 0x1d6   : > { %1253 = vmatpush.bf16.msra.mxu1 %v1242_v39 }
 0x1da   : > { %1254 = vmatpush.bf16.msra.mxu1 %v1241_v49 }
 0x1de   : > { %1255 = vmatpush.bf16.msra.mxu1 %v1240_v5 }
 0x24d   : > { %v1128_v16 = vpop.f32.mrf.mxu0 }
 0x24e   : > { %v2157_v18 = vadd.f32 %v1782_v12, %v1128_v16 }
 0x250   : > { %v2160_v19 = vmul.f32 0.70710677, %v2157_v18 }
 0x252   : > { %v1137_v24 = vmul.f32 %v2160_v19, %v2160_v19 }
 0x254   : > { %v2176_v33 = vmin.f32 %v1137_v24, 16.0 }
 0x255   : > { %v1130_v36 = vpop.f32.mrf.mxu0 }
 0x256   : > { %v1139_v37 = vmul.f32 2.1237322e-06, %v2176_v33  ;;  %v2185_v38 = vadd.f32 %v1782_v12, %v1130_v36  ;;  %v1150_v40 = vmul.f32 3.8918573e-05, %v2176_v33  ;;  %v1225_v12 = vld [vmem:[%s2496_s10 + $0x18] sm:$0xff] }
 0x257   : > { %v1239_v21 = vpack.c.bf16 %v1225_v12, %v1224_v13 }
 0x258   : > { %v1140_v41 = vadd.f32 0.00028619796, %v1139_v37  ;;  %v2189_v42 = vmul.f32 0.70710677, %v2185_v38  ;;  %v1151_v46 = vadd.f32 0.001143296, %v1150_v40  ;;  %v1238_v37 = vpack.c.bf16 %v1223_v28, %v1222_v25 }
 0x259   : > { %1256 = vmatpush.bf16.msra.mxu1 %v1239_v21 }
 0x25a   : > { %v1177_v47 = vmul.f32 %v2189_v42, %v2189_v42  ;;  %v1141_v48 = vmul.f32 %v1140_v41, %v2176_v33  ;;  %v1152_v50 = vmul.f32 %v1151_v46, %v2176_v33 }
 0x25c   : > { %v1178_v63 = vmin.f32 %v1177_v47, 16.0  ;;  %v1153_v59 = vadd.f32 0.014752088, %v1152_v50  ;;  %v1142_v4 = vadd.f32 0.0036580483, %v1141_v48 }
 0x25d   : > { %1257 = vmatpush.bf16.msra.mxu1 %v1238_v37 }
 0x25e   : > { %v1179_v2 = vmul.f32 2.1237322e-06, %v1178_v63  ;;  %v1190_v3 = vmul.f32 3.8918573e-05, %v1178_v63  ;;  %v1154_v8 = vmul.f32 %v1153_v59, %v2176_v33  ;;  %v1143_v20 = vmul.f32 %v1142_v4, %v2176_v33 }
 0x260   : > { %v1180_v11 = vadd.f32 0.00028619796, %v1179_v2  ;;  %v1191_v14 = vadd.f32 0.001143296, %v1190_v3  ;;  %v1155_v15 = vadd.f32 0.112945676, %v1154_v8 }
 0x261   : > { %v1144_v36 = vadd.f32 0.05243302, %v1143_v20 }
 0x262   : > { %v1181_v16 = vmul.f32 %v1180_v11, %v1178_v63  ;;  %v1192_v17 = vmul.f32 %v1191_v14, %v1178_v63  ;;  %v1156_v23 = vmul.f32 %v1155_v15, %v2176_v33 }
 0x263   : > { %v1145_v46 = vmul.f32 %v1144_v36, %v2176_v33 }
 0x264   : > { %v1182_v24 = vadd.f32 0.0036580483, %v1181_v16  ;;  %v1193_v30 = vadd.f32 0.014752088, %v1192_v17  ;;  %v1157_v34 = vadd.f32 0.4994258, %v1156_v23 }
 0x265   : > { %v1146_v50 = vadd.f32 0.18741608, %v1145_v46  ;;  %v1133_v46 = vmul.f32 0.5, %v2157_v18 }
 0x266   : > { %v1194_v35 = vmul.f32 %v1193_v30, %v1178_v63  ;;  %v1158_v39 = vmul.f32 %v1157_v34, %v2176_v33  ;;  %v1183_v40 = vmul.f32 %v1182_v24, %v1178_v63 }
 0x267   : > { %v1147_v3 = vmul.f32 %v1146_v50, %v2176_v33 }
 0x268   : > { %v1195_v41 = vadd.f32 0.112945676, %v1194_v35  ;;  %v1159_v9 = vadd.f32 1.0, %v1158_v39  ;;  %v1184_v47 = vadd.f32 0.05243302, %v1183_v40 }
 0x269   : > { %v1148_v12 = vadd.f32 1.1283791, %v1147_v3 }
 0x26a   : > { %v1196_v43 = vmul.f32 %v1195_v41, %v1178_v63  ;;  %1806 = vrcp.f32 %v1159_v9  ;;  %v1185_v53 = vmul.f32 %v1184_v47, %v1178_v63  ;;  %v1171_v8 = vand.u32 2147483648, %v1159_v9 }
 0x26b   : > { %v1169_v13 = vand.u32 2147483647, %v1159_v9  ;;  %vm1165_vm8 = vweird.f32 %v1159_v9  ;;  %v1149_v23 = vmul.f32 %v1148_v12, %v2160_v19  ;;  %v1134_v47 = vmul.f32 0.5, %v2185_v38 }
 0x26c   : > { %v1197_v48 = vadd.f32 0.4994258, %v1196_v43  ;;  %v1186_v4 = vadd.f32 0.18741608, %v1185_v53  ;;  %v1172_v17 = vor.u32 1.1754944e-38, %v1171_v8 }
 0x26d   : > { %vm1170_vm10 = vcmp.eq.f32.partialorder %v1169_v13, 8.507059e+37 }
 0x26e   : > { %v1198_v49 = vmul.f32 %v1197_v48, %v1178_v63  ;;  %v1187_v15 = vmul.f32 %v1186_v4, %v1178_v63 }
 0x270   : > { %v1199_v58 = vadd.f32 1.0, %v1198_v49  ;;  %v1807_v59 = vpop.eup %1806  ;;  %v1188_v25 = vadd.f32 1.1283791, %v1187_v15 }
 0x271   : > { %v1161_v2 = vmul.f32 %v1807_v59, %v1159_v9  ;;  %vm1166_vm15 = vweird.f32 %v1807_v59 }
 0x272   : > { %1808 = vrcp.f32 %v1199_v58  ;;  %vm1167_vm9 = vmor %vm1165_vm8, %vm1166_vm15  ;;  %v1211_v28 = vand.u32 2147483648, %v1199_v58  ;;  %v1209_v35 = vand.u32 2147483647, %v1199_v58  ;;  %vm1205_vm12 = vweird.f32 %v1199_v58 }
 0x273   : > { %v1162_v5 = vsub.f32 1.0, %v1161_v2  ;;  %v1189_v37 = vmul.f32 %v1188_v25, %v2189_v42  ;;  %v1783_v42 = vld [vmem:[%s2497_s11] ss:$0 sm:$0xff] }
 0x274   : > { %v1212_v63 = vor.u32 1.1754944e-38, %v1211_v28  ;;  %vm1210_vm14 = vcmp.eq.f32.partialorder %v1209_v35, 8.507059e+37 }
 0x275   : > { %v1163_v11 = vmul.f32 %v1807_v59, %v1162_v5  ;;  %v1272_v5 = vld [vmem:[%s760_s6] sm:$0xff] }
 0x277   : > { %v1164_v16 = vadd.f32 %v1807_v59, %v1163_v11  ;;  %v1273_v11 = vld [vmem:[%s760_s6 + $0x8] sm:$0xff] }
 0x278   : > { %v1809_v14 = vpop.eup %1808 }
 0x279   : > { %v1201_v20 = vmul.f32 %v1809_v14, %v1199_v58  ;;  %v1168_v21 = vsel %vm1167_vm9, %v1807_v59, %v1164_v16  ;;  %vm1206_vm11 = vweird.f32 %v1809_v14  ;;  %v1784_v59 = vld [vmem:[%s2498_s12] ss:$0 sm:$0xff] }
 0x27a   : > { %v1173_v24 = vsel %vm1170_vm10, %v1172_v17, %v1168_v21  ;;  %vm1207_vm13 = vmor %vm1205_vm12, %vm1206_vm11  ;;  %v1787_v17 = vld [vmem:[%s2499_s13 + $0x1] ss:$0 sm:$0xff] }
 0x27b   : > { %v1202_v33 = vsub.f32 1.0, %v1201_v20  ;;  %v1174_v30 = vmul.f32 %v1173_v24, %v1149_v23 }
 0x27d   : > { %v1203_v34 = vmul.f32 %v1809_v14, %v1202_v33  ;;  %v1748_v39 = vclamps-f32 %v1174_v30, 1.0  ;;  %v1788_v33 = vld [vmem:[%s2499_s13 + $0x2] ss:$0 sm:$0xff] }
 0x27f   : > { %v1204_v36 = vadd.f32 %v1809_v14, %v1203_v34  ;;  %v1217_v43 = vadd.f32 1.0, %v1748_v39  ;;  %v1785_v34 = vld [vmem:[%s2500_s14] ss:$0 sm:$0xff] }
 0x281   : > { %v1208_v40 = vsel %vm1207_vm13, %v1809_v14, %v1204_v36  ;;  %v1219_v49 = vmul.f32 %v1217_v43, %v1133_v46 }
 0x282   : > { %v1213_v41 = vsel %vm1210_vm14, %v1212_v63, %v1208_v40  ;;  %vm1608_vm14 = vcmask 130048  }
 0x283   : > { %v1214_v19 = vmul.f32 %v1213_v41, %v1189_v37  ;;  %v1789_v37 = vld [vmem:[%s2499_s13 + $0x3] ss:$0 sm:$0xff] }
 0x285   : > { %v1749_v9 = vclamps-f32 %v1214_v19, 1.0 }
 0x287   : > { %v1218_v48 = vadd.f32 1.0, %v1749_v9 }
 0x289   : > { %v1220_v50 = vmul.f32 %v1218_v48, %v1134_v47 }
 0x28b   : > { %v1221_v53 = vpack.c.bf16 %v1220_v50, %v1219_v49 }
 0x28d   : > { %1258 = vmatmul.bf16.vlgmr.msra.gmra.mxu1 %v1221_v53 }
 0x30a   : > { %v1259_v58 = vpop.f32.mrf.mxu1 }
 0x30b   : > { %v1260_v2 = vadd.f32 %v1783_v42, %v1259_v58 }
 0x30d   : > { %v1268_v3 = vmul.f32 %v1784_v59, %v1260_v2 }
 0x30f   : > { %v2240_v38 = vadd.f32 %v1268_v3, %v1972_v55  ;;  %v1786_v55 = vld [vmem:[%s2499_s13] ss:$0 sm:$0xff] }
 0x311   : > { %v2243_v13 = vadd.f32 %v1272_v5, %v2240_v38  ;;  %v1792_v5 = vld [vmem:[%s2499_s13 + $0x6] ss:$0 sm:$0xff] }
 0x312   : > { %v1261_v18 = vpop.f32.mrf.mxu1 }
 0x313   : > { %v1262_v4 = vadd.f32 %v1783_v42, %v1261_v18  ;;  %v1281_v15 = vrot.slane %v2243_v13, 4  ;;  %v1293_v16 = vrot.slane %v2243_v13, 5  ;;  %v1305_v24 = vrot.slane %v2243_v13, 6  ;;  %v1791_v42 = vld [vmem:[%s2499_s13 + $0x5] ss:$0 sm:$0xff] }
 0x314   : > { %v1317_v30 = vrot.slane %v2243_v13, 7  ;;  %v1335_v46 = vrot.slane %v2243_v13, 1  ;;  %v1347_v47 = vrot.slane %v2243_v13, 2 }
 0x315   : > { %v1269_v8 = vmul.f32 %v1784_v59, %v1262_v4 }
 0x317   : > { %v2246_v12 = vadd.f32 %v1269_v8, %v1974_v56  ;;  %v1359_v8 = vrot.slane %v2243_v13, 3 }
 0x319   : > { %v2249_v14 = vadd.f32 %v1273_v11, %v2246_v12 }
 0x31b   : > { %v1282_v20 = vrot.slane %v2249_v14, 4  ;;  %v1294_v56 = vrot.slane %v2249_v14, 5  ;;  %v1306_v21 = vrot.slane %v2249_v14, 6  ;;  %v1318_v23 = vrot.slane %v2249_v14, 7 }
 0x31c   : > { %v1336_v40 = vrot.slane %v2249_v14, 1  ;;  %v1348_v48 = vrot.slane %v2249_v14, 2 }
 0x31d   : > { %v2269_v25 = vsel %vm798_vm0, %v1282_v20, %v1281_v15  ;;  %v1296_v28 = vsel %vm827_vm1, %v1294_v56, %v1293_v16  ;;  %v1308_v63 = vsel %vm856_vm2, %v1306_v21, %v1305_v24  ;;  %v1320_v39 = vsel %vm885_vm3, %v1318_v23, %v1317_v30 }
 0x31e   : > { %v1287_v35 = vmul.f32 %v1786_v55, %v2269_v25  ;;  %v1299_v36 = vmul.f32 %v1787_v17, %v1296_v28  ;;  %v1283_v41 = vsel %vm798_vm0, %v1281_v15, %v1282_v20  ;;  %v1295_v9 = vsel %vm827_vm1, %v1293_v16, %v1294_v56  ;;  %v1793_v56 = vld [vmem:[%s2499_s13 + $0x7] ss:$0 sm:$0xff] }
 0x31f   : > { %v1311_v43 = vmul.f32 %v1788_v33, %v1308_v63  ;;  %v1323_v53 = vmul.f32 %v1789_v37, %v1320_v39  ;;  %v1300_v58 = vmul.f32 %v1787_v17, %v1295_v9  ;;  %v1337_v59 = vsel %vm920_vm4, %v1335_v46, %v1336_v40 }
 0x320   : > { %v1289_v19 = vmul.f32 %v1287_v35, %v1983_v61  ;;  %v1301_v50 = vmul.f32 %v1299_v36, %v1980_v60  ;;  %v1360_v61 = vrot.slane %v2249_v14, 3  ;;  %v1288_v2 = vmul.f32 %v1786_v55, %v1283_v41  ;;  %v1790_v60 = vld [vmem:[%s2499_s13 + $0x4] ss:$0 sm:$0xff] }
 0x321   : > { %v1307_v3 = vsel %vm856_vm2, %v1305_v24, %v1306_v21  ;;  %v1313_v4 = vmul.f32 %v1311_v43, %v1970_v54  ;;  %v1349_v11 = vsel %vm949_vm5, %v1347_v47, %v1348_v48  ;;  %v1319_v16 = vsel %vm885_vm3, %v1317_v30, %v1318_v23 }
 0x322   : > { %v1291_v49 = vadd.f32 %v1785_v34, %v1289_v19  ;;  %v1290_v15 = vmul.f32 %v1288_v2, %v2012_v10  ;;  %v1312_v55 = vmul.f32 %v1788_v33, %v1307_v3  ;;  %v1325_v17 = vmul.f32 %v1323_v53, %v2040_v29  ;;  %v1794_v29 = vld [vmem:[%s2499_s13 + $0x8] ss:$0 sm:$0xff] }
 0x323   : > { %v1341_v20 = vmul.f32 %v1791_v42, %v1337_v59  ;;  %v1302_v21 = vmul.f32 %v1300_v58, %v2004_v7  ;;  %v1361_v24 = vsel %vm978_vm6, %v1359_v8, %v1360_v61  ;;  %v1324_v35 = vmul.f32 %v1789_v37, %v1319_v16  ;;  %v1443_v16 = vld [vmem:[%s2503_s17 + $0x18] sm:$0xff] }
 0x324   : > { %v1303_v18 = vadd.f32 %v1301_v50, %v1291_v49  ;;  %v1292_v28 = vadd.f32 %v1785_v34, %v1290_v15  ;;  %v1331_v33 = vmul.f32 %v1790_v60, %v2243_v13  ;;  %v1353_v36 = vmul.f32 %v1792_v5, %v1349_v11 }
 0x325   : > { %v1338_v23 = vsel %vm920_vm4, %v1336_v40, %v1335_v46  ;;  %v1314_v63 = vmul.f32 %v1312_v55, %v1992_v0  ;;  %v1343_v39 = vmul.f32 %v1341_v20, %v2032_v22  ;;  %v1365_v19 = vmul.f32 %v1793_v56, %v1361_v24  ;;  %v1441_v20 = vld [vmem:[%s2503_s17 + $0x8] sm:$0xff] }
 0x326   : > { %v1315_v54 = vadd.f32 %v1313_v4, %v1303_v18  ;;  %v1304_v30 = vadd.f32 %v1302_v21, %v1292_v28  ;;  %v1350_v34 = vsel %vm949_vm5, %v1348_v48, %v1347_v47  ;;  %v1326_v13 = vmul.f32 %v1324_v35, %v2038_v27 }
 0x327   : > { %v1342_v9 = vmul.f32 %v1791_v42, %v1338_v23  ;;  %v1355_v49 = vmul.f32 %v1353_v36, %v2073_v62  ;;  %v1373_v50 = vmul.f32 %v1794_v29, %v1283_v41  ;;  %v1362_v40 = vsel %vm978_vm6, %v1360_v61, %v1359_v8 }
 0x328   : > { %v1327_v10 = vadd.f32 %v1325_v17, %v1315_v54  ;;  %v1316_v37 = vadd.f32 %v1314_v63, %v1304_v30  ;;  %v1332_v0 = vmul.f32 %v1790_v60, %v2249_v14  ;;  %v1354_v53 = vmul.f32 %v1792_v5, %v1350_v34  ;;  %v1440_v54 = vld [vmem:[%s2503_s17] sm:$0xff] }
 0x329   : > { %v1367_v58 = vmul.f32 %v1365_v19, %v2101_v31  ;;  %v1344_v47 = vmul.f32 %v1342_v9, %v2076_v1  ;;  %v1366_v48 = vmul.f32 %v1793_v56, %v1362_v40  ;;  %v1375_v42 = vmul.f32 %v1373_v50, %v2103_v32  ;;  %v1796_v40 = vld [vmem:[%s2502_s16] ss:$0 sm:$0xff] }
 0x32a   : > { %v1333_v7 = vadd.f32 %v1331_v33, %v1327_v10  ;;  %v1328_v46 = vadd.f32 %v1326_v13, %v1316_v37  ;;  %v1356_v62 = vmul.f32 %v1354_v53, %v2070_v52  ;;  %v1374_v57 = vmul.f32 %v1794_v29, %v2269_v25 }
 0x32b   : > { %v1368_v14 = vmul.f32 %v1366_v48, %v2098_v26  ;;  %v1444_v56 = vpack.c.bf16 %v1441_v20, %v1440_v54 }
 0x32c   : > { %v1345_v43 = vadd.f32 %v1343_v39, %v1333_v7  ;;  %v1334_v59 = vadd.f32 %v1332_v0, %v1328_v46  ;;  %v1376_v31 = vmul.f32 %v1374_v57, %v2112_v45 }
 0x32e   : > { %v1357_v22 = vadd.f32 %v1355_v49, %v1345_v43  ;;  %v1346_v2 = vadd.f32 %v1344_v47, %v1334_v59  ;;  %v1797_v47 = vld [vmem:[%s2504_s18] ss:$0 sm:$0xff] }
 0x330   : > { %v1369_v27 = vadd.f32 %v1367_v58, %v1357_v22  ;;  %v1358_v61 = vadd.f32 %v1356_v62, %v1346_v2  ;;  %v1570_v2 = vld [vmem:[%s2505_s19 + $0x70] sm:$0xff]  ;;  %v1571_v62 = vld [vmem:[%s2505_s19 + $0x78] sm:$0xff] }
 0x331   : > { %v1579_v57 = vpack.c.bf16 %v1571_v62, %v1570_v2 }
 0x332   : > { %v1377_v41 = vadd.f32 %v1375_v42, %v1369_v27  ;;  %v1370_v18 = vadd.f32 %v1368_v14, %v1358_v61  ;;  %v1568_v61 = vld [vmem:[%s2505_s19 + $0x60] sm:$0xff]  ;;  %v1569_v14 = vld [vmem:[%s2505_s19 + $0x68] sm:$0xff] }
 0x333   : > { %1584 = vmatpush.bf16.msra.mxu3 %v1579_v57 }
 0x334   : > { %v1379_v3 = vmul.f32 %v1377_v41, %v2110_v44  ;;  %v1378_v4 = vadd.f32 %v1376_v31, %v1370_v18  ;;  %v1566_v31 = vld [vmem:[%s2505_s19 + $0x50] sm:$0xff] }
 0x336   : > { %v1381_v1 = vadd.f32 %v1379_v3, %v2240_v38  ;;  %v1380_v32 = vmul.f32 %v1378_v4, %v2117_v51  ;;  %v1578_v3 = vpack.c.bf16 %v1569_v14, %v1568_v61 }
 0x338   : > { %v1383_v60 = vsel %vm1041_vm7, %v1381_v1, 0.0  ;;  %v1382_v52 = vadd.f32 %v1380_v32, %v2246_v12  ;;  %v1442_v12 = vld [vmem:[%s2503_s17 + $0x10] sm:$0xff]  ;;  %1585 = vmatpush.bf16.msra.mxu3 %v1578_v3 }
 0x339   : > { %1384 = vadd.xlane.f32.xlu0 %v1383_v60  ;;  %v1445_v17 = vpack.c.bf16 %v1443_v16, %v1442_v12  ;;  %v1562_v12 = vld [vmem:[%s2505_s19 + $0x30] sm:$0xff]  ;;  %v1563_v16 = vld [vmem:[%s2505_s19 + $0x38] sm:$0xff] }
 0x33a   : > { %v1386_v25 = vsel %vm1041_vm7, %v1382_v52, 0.0 }
 0x33b   : > { %1387 = vadd.xlane.f32.xlu1 %v1386_v25  ;;  %1459 = vmatpush.bf16.msra.mxu2 %v1445_v17 }
 0x33f   : > { %1460 = vmatpush.bf16.msra.mxu2 %v1444_v56 }
 0x3ac   : > { %v1385_v5 = vpop.xlane.xlu0 %1384 }
 0x3ad   : > { %v1389_v26 = vmul.f32 %v1385_v5, %v2121_v6 }
 0x3ae   : > { %v1388_v8 = vpop.xlane.xlu1 %1387 }
 0x3af   : > { %v1391_v44 = vsub.f32 %v1381_v1, %v1389_v26  ;;  %v1390_v45 = vmul.f32 %v1388_v8, %v2121_v6  ;;  %v1567_v1 = vld [vmem:[%s2505_s19 + $0x58] sm:$0xff]  ;;  %v1565_v8 = vld [vmem:[%s2505_s19 + $0x48] sm:$0xff] }
 0x3b1   : > { %v1393_v11 = vmul.f32 %v1391_v44, %v1391_v44  ;;  %v1392_v15 = vsub.f32 %v1382_v52, %v1390_v45  ;;  %v1577_v52 = vpack.c.bf16 %v1567_v1, %v1566_v31 }
 0x3b3   : > { %v1395_v38 = vsel %vm1041_vm7, %v1393_v11, 0.0  ;;  %v1394_v55 = vmul.f32 %v1392_v15, %v1392_v15  ;;  %1586 = vmatpush.bf16.msra.mxu3 %v1577_v52 }
 0x3b4   : > { %1396 = vadd.xlane.f32.xlu2 %v1395_v38 }
 0x3b5   : > { %v1398_v51 = vsel %vm1041_vm7, %v1394_v55, 0.0 }
 0x3b6   : > { %1399 = vadd.xlane.f32.xlu0 %v1398_v51 }
 0x427   : > { %v1397_v21 = vpop.xlane.xlu2 %1396 }
 0x428   : > { %v1401_v24 = vmul.f32 %v1397_v21, %v2121_v6  ;;  %v1575_v21 = vpack.c.bf16 %v1563_v16, %v1562_v12 }
 0x429   : > { %v1400_v35 = vpop.xlane.xlu0 %1399 }
 0x42a   : > { %v1403_v28 = vadd.f32 1e-06, %v1401_v24  ;;  %v1402_v10 = vmul.f32 %v1400_v35, %v2121_v6  ;;  %v1795_v6 = vld [vmem:[%s2501_s15] ss:$0 sm:$0xff] }
 0x42b   : > { %v1560_v35 = vld [vmem:[%s2505_s19 + $0x20] sm:$0xff] }
 0x42c   : > { %1810 = vrsqrt.f32 %v1403_v28  ;;  %v1404_v33 = vadd.f32 1e-06, %v1402_v10  ;;  %vm1411_vm1 = vweird.f32 %v1403_v28  ;;  %v1561_v10 = vld [vmem:[%s2505_s19 + $0x28] sm:$0xff] }
 0x42e   : > { %1812 = vrsqrt.f32 %v1404_v33  ;;  %vm1421_vm4 = vweird.f32 %v1404_v33 }
 0x432   : > { %v1811_v36 = vpop.eup %1810 }
 0x433   : > { %v1406_v29 = vmul.f32 %v1811_v36, %v1403_v28  ;;  %vm1412_vm0 = vweird.f32 %v1811_v36 }
 0x434   : > { %v1813_v30 = vpop.eup %1812  ;;  %vm1413_vm2 = vmor %vm1411_vm1, %vm1412_vm0 }
 0x435   : > { %v1407_v23 = vmul.f32 %v1811_v36, %v1406_v29  ;;  %v1416_v7 = vmul.f32 %v1813_v30, %v1404_v33  ;;  %vm1422_vm3 = vweird.f32 %v1813_v30 }
 0x436   : > { %vm1423_vm5 = vmor %vm1421_vm4, %vm1422_vm3 }
 0x437   : > { %v1408_v63 = vmul.f32 0.5, %v1407_v23  ;;  %v1417_v19 = vmul.f32 %v1813_v30, %v1416_v7 }
 0x439   : > { %v1409_v39 = vsub.f32 1.5, %v1408_v63  ;;  %v1418_v37 = vmul.f32 0.5, %v1417_v19  ;;  %v1574_v63 = vpack.c.bf16 %v1561_v10, %v1560_v35  ;;  %v1558_v19 = vld [vmem:[%s2505_s19 + $0x10] sm:$0xff] }
 0x43b   : > { %v1410_v34 = vmul.f32 %v1811_v36, %v1409_v39  ;;  %v1419_v43 = vsub.f32 1.5, %v1418_v37 }
 0x43d   : > { %v1414_v13 = vsel %vm1413_vm2, %v1811_v36, %v1410_v34  ;;  %v1420_v49 = vmul.f32 %v1813_v30, %v1419_v43  ;;  %v1559_v34 = vld [vmem:[%s2505_s19 + $0x18] sm:$0xff] }
 0x43e   : > { %v1425_v9 = vmul.f32 %v1414_v13, %v1391_v44  ;;  %v1564_v44 = vld [vmem:[%s2505_s19 + $0x40] sm:$0xff]  ;;  %v1573_v43 = vpack.c.bf16 %v1559_v34, %v1558_v19 }
 0x43f   : > { %v1424_v46 = vsel %vm1423_vm5, %v1813_v30, %v1420_v49 }
 0x440   : > { %v1431_v50 = vmul.f32 %v1795_v6, %v1425_v9  ;;  %v1426_v0 = vmul.f32 %v1424_v46, %v1392_v15  ;;  %v1576_v15 = vpack.c.bf16 %v1565_v8, %v1564_v44  ;;  %v1557_v46 = vld [vmem:[%s2505_s19 + $0x8] sm:$0xff] }
 0x442   : > { %v1432_v53 = vmul.f32 %v1795_v6, %v1426_v0  ;;  %v2375_v22 = vadd.f32 %v1796_v40, %v1431_v50  ;;  %1587 = vmatpush.bf16.msra.mxu3 %v1576_v15 }
 0x444   : > { %v2377_v58 = vadd.f32 %v1796_v40, %v1432_v53  ;;  %v1556_v40 = vld [vmem:[%s2505_s19] sm:$0xff] }
 0x446   : > { %v1439_v59 = vpack.c.bf16 %v2377_v58, %v2375_v22  ;;  %1588 = vmatpush.bf16.msra.mxu3 %v1575_v21 }
 0x448   : > { %1750 = vmatmul.msk.bf16.vlgmr.msra.gmra.mxu2 %vm1041_vm7, %v1439_v59 }
 0x44a   : > { %1589 = vmatpush.bf16.msra.mxu3 %v1574_v63 }
 0x44e   : > { %1590 = vmatpush.bf16.msra.mxu3 %v1573_v43 }
 0x4cb   : > { %v1462_v48 = vpop.f32.mrf.mxu2 }
 0x4cc   : > { %v2385_v27 = vadd.f32 %v1797_v47, %v1462_v48  ;;  %v1572_v48 = vpack.c.bf16 %v1557_v46, %v1556_v40  ;;  %v1607_v40 = vld [vmem:[%s2508_s22 + $0x8] sm:$0xff] }
 0x4ce   : > { %v2388_v42 = vmul.f32 0.70710677, %v2385_v27  ;;  %1591 = vmatpush.bf16.msra.mxu3 %v1572_v48 }
 0x4d0   : > { %v1471_v41 = vmul.f32 %v2388_v42, %v2388_v42 }
 0x4d2   : > { %v2404_v18 = vmin.f32 %v1471_v41, 16.0 }
 0x4d3   : > { %v1464_v4 = vpop.f32.mrf.mxu2 }
 0x4d4   : > { %v1473_v60 = vmul.f32 2.1237322e-06, %v2404_v18  ;;  %v2413_v32 = vadd.f32 %v1797_v47, %v1464_v4  ;;  %v1484_v25 = vmul.f32 3.8918573e-05, %v2404_v18 }
 0x4d6   : > { %v1474_v5 = vadd.f32 0.00028619796, %v1473_v60  ;;  %v2417_v26 = vmul.f32 0.70710677, %v2413_v32  ;;  %v1485_v11 = vadd.f32 0.001143296, %v1484_v25 }
 0x4d8   : > { %v1511_v45 = vmul.f32 %v2417_v26, %v2417_v26  ;;  %v1475_v38 = vmul.f32 %v1474_v5, %v2404_v18  ;;  %v1486_v55 = vmul.f32 %v1485_v11, %v2404_v18 }
 0x4da   : > { %v1512_v51 = vmin.f32 %v1511_v45, 16.0  ;;  %v1487_v54 = vadd.f32 0.014752088, %v1486_v55  ;;  %v1476_v56 = vadd.f32 0.0036580483, %v1475_v38 }
 0x4dc   : > { %v1513_v17 = vmul.f32 2.1237322e-06, %v1512_v51  ;;  %v1524_v20 = vmul.f32 3.8918573e-05, %v1512_v51  ;;  %v1488_v24 = vmul.f32 %v1487_v54, %v2404_v18  ;;  %v1477_v30 = vmul.f32 %v1476_v56, %v2404_v18 }
 0x4de   : > { %v1514_v28 = vadd.f32 0.00028619796, %v1513_v17  ;;  %v1525_v33 = vadd.f32 0.001143296, %v1524_v20  ;;  %v1489_v36 = vadd.f32 0.112945676, %v1488_v24 }
 0x4df   : > { %v1478_v9 = vadd.f32 0.05243302, %v1477_v30  ;;  %v1468_v30 = vmul.f32 0.5, %v2413_v32 }
 0x4e0   : > { %v1515_v29 = vmul.f32 %v1514_v28, %v1512_v51  ;;  %v1526_v23 = vmul.f32 %v1525_v33, %v1512_v51  ;;  %v1490_v7 = vmul.f32 %v1489_v36, %v2404_v18 }
 0x4e1   : > { %v1479_v47 = vmul.f32 %v1478_v9, %v2404_v18 }
 0x4e2   : > { %v1516_v39 = vadd.f32 0.0036580483, %v1515_v29  ;;  %v1527_v37 = vadd.f32 0.014752088, %v1526_v23  ;;  %v1491_v13 = vadd.f32 0.4994258, %v1490_v7 }
 0x4e3   : > { %v1480_v41 = vadd.f32 0.18741608, %v1479_v47  ;;  %v1467_v23 = vmul.f32 0.5, %v2385_v27 }
 0x4e4   : > { %v1528_v6 = vmul.f32 %v1527_v37, %v1512_v51  ;;  %v1492_v49 = vmul.f32 %v1491_v13, %v2404_v18  ;;  %v1517_v50 = vmul.f32 %v1516_v39, %v1512_v51  ;;  %v1799_v13 = vld [vmem:[%s2507_s21] ss:$0 sm:$0xff] }
 0x4e5   : > { %v1481_v1 = vmul.f32 %v1480_v41, %v2404_v18 }
 0x4e6   : > { %v1529_v0 = vadd.f32 0.112945676, %v1528_v6  ;;  %v1493_v53 = vadd.f32 1.0, %v1492_v49  ;;  %v1518_v2 = vadd.f32 0.05243302, %v1517_v50  ;;  %v1606_v50 = vld [vmem:[%s2508_s22] sm:$0xff] }
 0x4e7   : > { %v1482_v44 = vadd.f32 1.1283791, %v1481_v1 }
 0x4e8   : > { %v1530_v59 = vmul.f32 %v1529_v0, %v1512_v51  ;;  %1814 = vrcp.f32 %v1493_v53  ;;  %v1519_v61 = vmul.f32 %v1518_v2, %v1512_v51  ;;  %v1505_v52 = vand.u32 2147483648, %v1493_v53 }
 0x4e9   : > { %v1503_v5 = vand.u32 2147483647, %v1493_v53  ;;  %vm1499_vm15 = vweird.f32 %v1493_v53  ;;  %v1483_v12 = vmul.f32 %v1482_v44, %v2388_v42 }
 0x4ea   : > { %v1531_v62 = vadd.f32 0.4994258, %v1530_v59  ;;  %v1520_v4 = vadd.f32 0.18741608, %v1519_v61  ;;  %v1506_v38 = vor.u32 1.1754944e-38, %v1505_v52 }
 0x4eb   : > { %vm1504_vm9 = vcmp.eq.f32.partialorder %v1503_v5, 8.507059e+37 }
 0x4ec   : > { %v1532_v57 = vmul.f32 %v1531_v62, %v1512_v51  ;;  %v1521_v11 = vmul.f32 %v1520_v4, %v1512_v51 }
 0x4ee   : > { %v1533_v14 = vadd.f32 1.0, %v1532_v57  ;;  %v1815_v3 = vpop.eup %1814  ;;  %v1522_v54 = vadd.f32 1.1283791, %v1521_v11 }
 0x4ef   : > { %v1495_v31 = vmul.f32 %v1815_v3, %v1493_v53  ;;  %vm1500_vm6 = vweird.f32 %v1815_v3 }
 0x4f0   : > { %1816 = vrcp.f32 %v1533_v14  ;;  %vm1501_vm8 = vmor %vm1499_vm15, %vm1500_vm6  ;;  %v1545_v17 = vand.u32 2147483648, %v1533_v14  ;;  %v1543_v21 = vand.u32 2147483647, %v1533_v14  ;;  %vm1539_vm11 = vweird.f32 %v1533_v14 }
 0x4f1   : > { %v1496_v60 = vsub.f32 1.0, %v1495_v31  ;;  %v1523_v28 = vmul.f32 %v1522_v54, %v2417_v26  ;;  %v1798_v26 = vld [vmem:[%s2506_s20] ss:$0 sm:$0xff] }
 0x4f2   : > { %v1546_v51 = vor.u32 1.1754944e-38, %v1545_v17  ;;  %vm1544_vm13 = vcmp.eq.f32.partialorder %v1543_v21, 8.507059e+37 }
 0x4f3   : > { %v1497_v25 = vmul.f32 %v1815_v3, %v1496_v60 }
 0x4f5   : > { %v1498_v45 = vadd.f32 %v1815_v3, %v1497_v25 }
 0x4f6   : > { %v1817_v8 = vpop.eup %1816 }
 0x4f7   : > { %v1535_v15 = vmul.f32 %v1817_v8, %v1533_v14  ;;  %v1502_v55 = vsel %vm1501_vm8, %v1815_v3, %v1498_v45  ;;  %vm1540_vm10 = vweird.f32 %v1817_v8 }
 0x4f8   : > { %v1507_v16 = vsel %vm1504_vm9, %v1506_v38, %v1502_v55  ;;  %vm1541_vm12 = vmor %vm1539_vm11, %vm1540_vm10 }
 0x4f9   : > { %v1536_v18 = vsub.f32 1.0, %v1535_v15  ;;  %v1508_v20 = vmul.f32 %v1507_v16, %v1483_v12 }
 0x4fb   : > { %v1537_v56 = vmul.f32 %v1817_v8, %v1536_v18  ;;  %v1751_v35 = vclamps-f32 %v1508_v20, 1.0 }
 0x4fd   : > { %v1538_v24 = vadd.f32 %v1817_v8, %v1537_v56  ;;  %v1551_v29 = vadd.f32 1.0, %v1751_v35 }
 0x4ff   : > { %v1542_v10 = vsel %vm1541_vm12, %v1817_v8, %v1538_v24  ;;  %v1553_v7 = vmul.f32 %v1551_v29, %v1467_v23 }
 0x500   : > { %v1547_v33 = vsel %vm1544_vm13, %v1546_v51, %v1542_v10 }
 0x501   : > { %v1548_v36 = vmul.f32 %v1547_v33, %v1523_v28 }
 0x503   : > { %v1752_v42 = vclamps-f32 %v1548_v36, 1.0 }
 0x505   : > { %v1552_v63 = vadd.f32 1.0, %v1752_v42 }
 0x507   : > { %v1554_v39 = vmul.f32 %v1552_v63, %v1468_v30 }
 0x509   : > { %v1555_v19 = vpack.c.bf16 %v1554_v39, %v1553_v7 }
 0x50b   : > { %1592 = vmatmul.bf16.vlgmr.msra.gmra.mxu3 %v1555_v19 }
 0x58e   : > { %v1593_v34 = vpop.f32.mrf.mxu3 }
 0x58f   : > { %v1594_v37 = vadd.f32 %v1798_v26, %v1593_v34 }
 0x591   : > { %v1602_v9 = vmul.f32 %v1799_v13, %v1594_v37 }
 0x593   : > { %v1604_v49 = vadd.f32 %v1602_v9, %v2375_v22 }
 0x596   : > { %v1595_v6 = vpop.f32.mrf.mxu3 }
 0x597   : > { %v1596_v27 = vadd.f32 %v1798_v26, %v1595_v6 }
 0x599   : > { %v1603_v32 = vmul.f32 %v1799_v13, %v1596_v27 }
 0x59b   : > { %v1605_v43 = vadd.f32 %v1603_v32, %v2377_v58 }
 0x59d   : > { %1629 = vmatpush.msrb.mxu0 %v1605_v43 }
 0x59f   : > { %1630 = vmatpush.msrb.mxu0 %v1604_v49 }
 0x5a0   : > { %1753 = vmatmul.msk.f32.vlgmr.msrb.gmra.mxu0 %vm1608_vm14, %v1606_v50 }
 0x5a8   : > { %1754 = vmatmul.msk.f32.gmra.mxu0 %vm1608_vm14, %v1607_v40 }
 0x61d   : > { %v1632_v58 = vpop.f32.mrf.mxu0 }
 0x61e   : > { %1638 = vst.msk [vmem:[%s778_s3] sm:$0xff] %vm1041_vm7, %v1632_v58 }
 0x625   : > { %v1635_v22 = vpop.f32.mrf.mxu0 }
 0x626   : > { %1639 = vst.msk [vmem:[%s778_s3 + $0x8] sm:$0xff] %vm1041_vm7, %v1635_v22 }
 0x627 PF: > { %s33_s4 = sadd.s32 1, %s1824_s4  }
 0x628   : > { %p30_p4 = scmp.ge.s32.totalorder %s33_s4, 4  }
 0x62a   :  { %32 = sbr.rel (!%p30_p4) target bundleno = 9 (0x9), region = 151 }

</bundles_post_ra>
